<compile_context>
chip_gen: v7x
topology: tpu7x:2x2x1
jax: 0.10.0
libtpu: 0.0.40
codegen_flags: <defaults>
</compile_context>

<pallas_src>
import functools

import jax
import jax.numpy as jnp
from jax.experimental import pallas as pl
from jax.experimental.pallas import tpu as pltpu

_BN_EPS = 1e-5

# -----------------------------------------------------------------------------
# Pallas kernels
# -----------------------------------------------------------------------------

def _linear_act_kernel(x_ref, w_ref, b_ref, o_ref, *, relu):
    # o = relu?(x @ w + b)   x:(TM,K) w:(K,N) b:(1,N)
    y = jnp.dot(x_ref[...], w_ref[...], preferred_element_type=jnp.float32)
    y = y + b_ref[...]
    if relu:
        y = jnp.maximum(y, 0.0)
    o_ref[...] = y


def fused_linear(x, w, b, *, relu, tile_m=256):
    """Fused (folded-BN) linear + bias + optional ReLU, tiled over rows."""
    M, K = x.shape
    N = w.shape[1]
    tm = min(tile_m, M)
    if M % tm:            # shapes in this model always divide; safe fallback
        tm = M
    return pl.pallas_call(
        functools.partial(_linear_act_kernel, relu=relu),
        out_shape=jax.ShapeDtypeStruct((M, N), jnp.float32),
        grid_spec=pltpu.PrefetchScalarGridSpec(
            num_scalar_prefetch=0,
            grid=(M // tm,),
            in_specs=[
                pl.BlockSpec((tm, K), lambda i: (i, 0)),   # row tile of x
                pl.BlockSpec((K, N), lambda i: (0, 0)),    # weights: VMEM-resident
                pl.BlockSpec((1, N), lambda i: (0, 0)),    # folded bias
            ],
            out_specs=pl.BlockSpec((tm, N), lambda i: (i, 0)),
        ),
        compiler_params=pltpu.CompilerParams(
            dimension_semantics=("parallel",)),
    )(x.astype(jnp.float32), w, b.reshape(1, N))


def _mlp_head_kernel(x_ref, w1_ref, b1_ref, w2_ref, b2_ref, w3_ref, b3_ref,
                     o_ref):
    # fc1 (+folded BN) + ReLU -> fc2 (+folded BN) + ReLU -> fc3
    h = jnp.dot(x_ref[...], w1_ref[...], preferred_element_type=jnp.float32)
    h = jnp.maximum(h + b1_ref[...], 0.0)
    h = jnp.dot(h, w2_ref[...], preferred_element_type=jnp.float32)
    h = jnp.maximum(h + b2_ref[...], 0.0)
    o_ref[...] = (
        jnp.dot(h, w3_ref[...], preferred_element_type=jnp.float32) + b3_ref[...]
    )


def fused_mlp_head(x, w1, b1, w2, b2, w3, b3):
    B = x.shape[0]
    N = w3.shape[1]
    vmem = pl.BlockSpec(memory_space=pltpu.MemorySpace.VMEM)
    return pl.pallas_call(
        _mlp_head_kernel,
        out_shape=jax.ShapeDtypeStruct((B, N), jnp.float32),
        in_specs=[vmem] * 7,
        out_specs=vmem,
    )(x.astype(jnp.float32), w1, b1.reshape(1, -1),
      w2, b2.reshape(1, -1), w3, b3.reshape(1, -1))


# -----------------------------------------------------------------------------
# JAX glue: layout, im2col, max-pool
# -----------------------------------------------------------------------------

def im2col_3x3(x):
    """x: (B,H,W,C) NHWC -> (B*H*W, 9*C) for a 3x3, stride-1, pad-1 conv.

    Column order is (ky, kx, cin), matching the folded weight layout below."""
    B, H, W, C = x.shape
    xp = jnp.pad(x, ((0, 0), (1, 1), (1, 1), (0, 0)))
    taps = [xp[:, ky:ky + H, kx:kx + W, :]
            for ky in range(3) for kx in range(3)]
    cols = jnp.concatenate(taps, axis=-1)          # (B,H,W,9C)
    return cols.reshape(B * H * W, 9 * C)


def maxpool_2x2(x):
    B, H, W, C = x.shape
    return x.reshape(B, H // 2, 2, W // 2, 2, C).max(axis=(2, 4))


def conv_stage(x, w_mat, b_vec, *, pool):
    """One fused pallas_call: conv3x3(pad=1) + folded BN + ReLU; pool in glue."""
    B, H, W, _ = x.shape
    y = fused_linear(im2col_3x3(x), w_mat, b_vec, relu=True)
    y = y.reshape(B, H, W, -1)
    if pool:
        y = maxpool_2x2(y)
    return y


# -----------------------------------------------------------------------------
# Parameters (PyTorch-style layout) + BN folding
# -----------------------------------------------------------------------------

def init_params(key, in_chans=3, H=16, W=16, num_classes=10):
    def nrm(k, shape, std=0.05):
        return (std * jax.random.normal(k, shape)).astype(jnp.float32)

    def bn_params(k, c):
        k1, k2, k3, k4 = jax.random.split(k, 4)
        return dict(
            gamma=1.0 + 0.1 * jax.random.normal(k1, (c,), jnp.float32),
            beta=0.1 * jax.random.normal(k2, (c,), jnp.float32),
            mean=0.1 * jax.random.normal(k3, (c,), jnp.float32),
            var=jnp.abs(1.0 + 0.1 * jax.random.normal(k4, (c,), jnp.float32)),
        )

    keys = iter(jax.random.split(key, 64))
    chans = [in_chans, 16, 32, 64, 128]
    convs = []
    for i in range(4):
        cin, cout = chans[i], chans[i + 1]
        convs.append(dict(
            w=nrm(next(keys), (cout, cin, 3, 3)),   # PyTorch OIHW layout
            b=nrm(next(keys), (cout,)),
            bn=bn_params(next(keys), cout),
        ))
    feat = 128 * (H // 8) * (W // 8)
    fcs = [
        dict(w=nrm(next(keys), (128, feat)), b=nrm(next(keys), (128,)),
             bn=bn_params(next(keys), 128)),
        dict(w=nrm(next(keys), (64, 128)), b=nrm(next(keys), (64,)),
             bn=bn_params(next(keys), 64)),
        dict(w=nrm(next(keys), (num_classes, 64)),
             b=nrm(next(keys), (num_classes,)), bn=None),
    ]
    return dict(convs=convs, fcs=fcs)


def fold_params(p):
    """Fold inference-mode BatchNorm into the preceding conv/linear weights."""
    folded = dict(convs=[], fcs=[])
    for c in p["convs"]:
        bn = c["bn"]
        scale = bn["gamma"] / jnp.sqrt(bn["var"] + _BN_EPS)
        w = c["w"] * scale[:, None, None, None]               # (Cout,Cin,3,3)
        b = (c["b"] - bn["mean"]) * scale + bn["beta"]
        # -> matmul layout (9*Cin, Cout), rows ordered (ky, kx, cin)
        w_mat = w.transpose(2, 3, 1, 0).reshape(-1, w.shape[0])
        folded["convs"].append((w_mat, b))
    for f in p["fcs"]:
        w, b = f["w"], f["b"]
        if f["bn"] is not None:
            bn = f["bn"]
            scale = bn["gamma"] / jnp.sqrt(bn["var"] + _BN_EPS)
            w = w * scale[:, None]
            b = (b - bn["mean"]) * scale + bn["beta"]
        folded["fcs"].append((w.T, b))                        # (in, out)
    return folded


# -----------------------------------------------------------------------------
# Full ModifiedLeNet forward (inference semantics)
# -----------------------------------------------------------------------------

def modified_lenet_forward(folded, x_nchw):
    # NCHW -> NHWC (channels on the lane axis for all kernels)
    x = x_nchw.astype(jnp.float32).transpose(0, 2, 3, 1)

    (w1, b1), (w2, b2), (w3, b3), (w4, b4) = folded["convs"]
    x = conv_stage(x, w1, b1, pool=True)    # conv1: Conv+BN+ReLU, MaxPool2x2
    x = conv_stage(x, w2, b2, pool=False)   # conv2: Conv+BN+ReLU
    x = conv_stage(x, w3, b3, pool=True)    # conv3: Conv+BN+ReLU, MaxPool2x2
    x = conv_stage(x, w4, b4, pool=True)    # conv4: Conv+BN+ReLU, MaxPool2x2

    # Flatten in PyTorch x.view(B, -1) order (C, H, W)
    B = x.shape[0]
    x = x.transpose(0, 3, 1, 2).reshape(B, -1)

    # fc1+BN+ReLU -> fc2+BN+ReLU -> fc3, one fused kernel (Dropout = identity
    # at inference).
    (fw1, fb1), (fw2, fb2), (fw3, fb3) = folded["fcs"]
    return fused_mlp_head(x, fw1, fb1, fw2, fb2, fw3, fb3)


# -----------------------------------------------------------------------------
# Main
# -----------------------------------------------------------------------------

if __name__ == "__main__":
    key = jax.random.PRNGKey(0)
    k_params, k_x = jax.random.split(key)

    B, C_in, H, W = 2, 3, 16, 16          # small shapes; H, W divisible by 8
    params = init_params(k_params, in_chans=C_in, H=H, W=W, num_classes=10)
    folded = fold_params(params)

    x = jax.random.normal(k_x, (B, C_in, H, W), dtype=jnp.float32)

    fwd = jax.jit(modified_lenet_forward)
    out = jax.block_until_ready(fwd(folded, x))

    assert out.shape == (B, 10), out.shape
    assert bool(jnp.all(jnp.isfinite(out)))
    print("KERNEL_OK")
</pallas_src>

<mosaic_0001>
module attributes {stable_mosaic.version = 11 : i64} {
  func.func @_linear_act_kernel(%arg0: i32, %arg1: memref<256x27xf32, #tpu.memory_space<vmem>>, %arg2: memref<27x16xf32, #tpu.memory_space<vmem>>, %arg3: memref<1x16xf32, #tpu.memory_space<vmem>>, %arg4: memref<256x16xf32, #tpu.memory_space<vmem>>) attributes {dimension_semantics = [#tpu.dimension_semantics<parallel>], iteration_bounds = array<i64: 2>, scalar_prefetch = 0 : i64, scratch_operands = 0 : i64, tpu.core_type = #tpu.core_type<tc>, window_params = [{transform_indices = @transform_0, window_bounds = array<i64: 256, 27>}, {pipeline_mode = #tpu.pipeline_mode<synchronous>, transform_indices = @transform_1, window_bounds = array<i64: 27, 16>}, {pipeline_mode = #tpu.pipeline_mode<synchronous>, transform_indices = @transform_2, window_bounds = array<i64: 1, 16>}, {transform_indices = @transform_3, window_bounds = array<i64: 256, 16>}]} {
    %c0 = arith.constant 0 : index
    %c0_0 = arith.constant 0 : index
    %0 = vector.load %arg1[%c0, %c0_0] : memref<256x27xf32, #tpu.memory_space<vmem>>, vector<256x27xf32>
    %c0_1 = arith.constant 0 : index
    %c0_2 = arith.constant 0 : index
    %1 = vector.load %arg2[%c0_1, %c0_2] : memref<27x16xf32, #tpu.memory_space<vmem>>, vector<27x16xf32>
    %cst = arith.constant dense<0.000000e+00> : vector<256x16xf32>
    %2 = tpu.matmul %0, %1, %cst {dimension_numbers = #tpu.dot_dimension_numbers<[1], [0], [0], [1], [0, 0, 1, 1], [], []>} : vector<256x27xf32>, vector<27x16xf32>, vector<256x16xf32> -> vector<256x16xf32>
    %c0_3 = arith.constant 0 : index
    %c0_4 = arith.constant 0 : index
    %3 = vector.load %arg3[%c0_3, %c0_4] : memref<1x16xf32, #tpu.memory_space<vmem>>, vector<1x16xf32>
    %4 = vector.broadcast %3 : vector<1x16xf32> to vector<256x16xf32>
    %5 = arith.addf %2, %4 : vector<256x16xf32>
    %cst_5 = arith.constant 0.000000e+00 : f32
    %6 = vector.broadcast %cst_5 : f32 to vector<256x16xf32>
    %7 = arith.maximumf %5, %6 : vector<256x16xf32>
    %c0_6 = arith.constant 0 : index
    %c0_7 = arith.constant 0 : index
    %8 = vector.load %arg4[%c0_6, %c0_7] : memref<256x16xf32, #tpu.memory_space<vmem>>, vector<256x16xf32>
    tpu.vector_store %arg4[%c0_6, %c0_7], %7 {strides = array<i32>} : memref<256x16xf32, #tpu.memory_space<vmem>>, vector<256x16xf32>,
    return
  }
  func.func @transform_0(%arg0: i32) -> (i32, i32) {
    %c0_i32 = arith.constant 0 : i32
    %c0_i32_0 = arith.constant 0 : i32
    return %arg0, %c0_i32 : i32, i32
  }
  func.func @transform_1(%arg0: i32) -> (i32, i32) {
    %c0_i32 = arith.constant 0 : i32
    %c0_i32_0 = arith.constant 0 : i32
    %c0_i32_1 = arith.constant 0 : i32
    return %c0_i32, %c0_i32_0 : i32, i32
  }
  func.func @transform_2(%arg0: i32) -> (i32, i32) {
    %c0_i32 = arith.constant 0 : i32
    %c0_i32_0 = arith.constant 0 : i32
    %c0_i32_1 = arith.constant 0 : i32
    return %c0_i32, %c0_i32_0 : i32, i32
  }
  func.func @transform_3(%arg0: i32) -> (i32, i32) {
    %c0_i32 = arith.constant 0 : i32
    %c0_i32_0 = arith.constant 0 : i32
    return %arg0, %c0_i32 : i32, i32
  }
}

module attributes {stable_mosaic.version = 11 : i64} {
  func.func @_linear_act_kernel(%arg0: i32, %arg1: memref<128x144xf32, #tpu.memory_space<vmem>>, %arg2: memref<144x32xf32, #tpu.memory_space<vmem>>, %arg3: memref<1x32xf32, #tpu.memory_space<vmem>>, %arg4: memref<128x32xf32, #tpu.memory_space<vmem>>) attributes {dimension_semantics = [#tpu.dimension_semantics<parallel>], iteration_bounds = array<i64: 1>, scalar_prefetch = 0 : i64, scratch_operands = 0 : i64, tpu.core_type = #tpu.core_type<tc>, window_params = [{transform_indices = @transform_0, window_bounds = array<i64: 128, 144>}, {pipeline_mode = #tpu.pipeline_mode<synchronous>, transform_indices = @transform_1, window_bounds = array<i64: 144, 32>}, {pipeline_mode = #tpu.pipeline_mode<synchronous>, transform_indices = @transform_2, window_bounds = array<i64: 1, 32>}, {transform_indices = @transform_3, window_bounds = array<i64: 128, 32>}]} {
    %c0 = arith.constant 0 : index
    %c0_0 = arith.constant 0 : index
    %0 = vector.load %arg1[%c0, %c0_0] : memref<128x144xf32, #tpu.memory_space<vmem>>, vector<128x144xf32>
    %c0_1 = arith.constant 0 : index
    %c0_2 = arith.constant 0 : index
    %1 = vector.load %arg2[%c0_1, %c0_2] : memref<144x32xf32, #tpu.memory_space<vmem>>, vector<144x32xf32>
    %cst = arith.constant dense<0.000000e+00> : vector<128x32xf32>
    %2 = tpu.matmul %0, %1, %cst {dimension_numbers = #tpu.dot_dimension_numbers<[1], [0], [0], [1], [0, 0, 1, 1], [], []>} : vector<128x144xf32>, vector<144x32xf32>, vector<128x32xf32> -> vector<128x32xf32>
    %c0_3 = arith.constant 0 : index
    %c0_4 = arith.constant 0 : index
    %3 = vector.load %arg3[%c0_3, %c0_4] : memref<1x32xf32, #tpu.memory_space<vmem>>, vector<1x32xf32>
    %4 = vector.broadcast %3 : vector<1x32xf32> to vector<128x32xf32>
    %5 = arith.addf %2, %4 : vector<128x32xf32>
    %cst_5 = arith.constant 0.000000e+00 : f32
    %6 = vector.broadcast %cst_5 : f32 to vector<128x32xf32>
    %7 = arith.maximumf %5, %6 : vector<128x32xf32>
    %c0_6 = arith.constant 0 : index
    %c0_7 = arith.constant 0 : index
    %8 = vector.load %arg4[%c0_6, %c0_7] : memref<128x32xf32, #tpu.memory_space<vmem>>, vector<128x32xf32>
    tpu.vector_store %arg4[%c0_6, %c0_7], %7 {strides = array<i32>} : memref<128x32xf32, #tpu.memory_space<vmem>>, vector<128x32xf32>,
    return
  }
  func.func @transform_0(%arg0: i32) -> (i32, i32) {
    %c0_i32 = arith.constant 0 : i32
    %c0_i32_0 = arith.constant 0 : i32
    return %arg0, %c0_i32 : i32, i32
  }
  func.func @transform_1(%arg0: i32) -> (i32, i32) {
    %c0_i32 = arith.constant 0 : i32
    %c0_i32_0 = arith.constant 0 : i32
    %c0_i32_1 = arith.constant 0 : i32
    return %c0_i32, %c0_i32_0 : i32, i32
  }
  func.func @transform_2(%arg0: i32) -> (i32, i32) {
    %c0_i32 = arith.constant 0 : i32
    %c0_i32_0 = arith.constant 0 : i32
    %c0_i32_1 = arith.constant 0 : i32
    return %c0_i32, %c0_i32_0 : i32, i32
  }
  func.func @transform_3(%arg0: i32) -> (i32, i32) {
    %c0_i32 = arith.constant 0 : i32
    %c0_i32_0 = arith.constant 0 : i32
    return %arg0, %c0_i32 : i32, i32
  }
}

module attributes {stable_mosaic.version = 11 : i64} {
  func.func @_linear_act_kernel(%arg0: i32, %arg1: memref<128x288xf32, #tpu.memory_space<vmem>>, %arg2: memref<288x64xf32, #tpu.memory_space<vmem>>, %arg3: memref<1x64xf32, #tpu.memory_space<vmem>>, %arg4: memref<128x64xf32, #tpu.memory_space<vmem>>) attributes {dimension_semantics = [#tpu.dimension_semantics<parallel>], iteration_bounds = array<i64: 1>, scalar_prefetch = 0 : i64, scratch_operands = 0 : i64, tpu.core_type = #tpu.core_type<tc>, window_params = [{transform_indices = @transform_0, window_bounds = array<i64: 128, 288>}, {pipeline_mode = #tpu.pipeline_mode<synchronous>, transform_indices = @transform_1, window_bounds = array<i64: 288, 64>}, {pipeline_mode = #tpu.pipeline_mode<synchronous>, transform_indices = @transform_2, window_bounds = array<i64: 1, 64>}, {transform_indices = @transform_3, window_bounds = array<i64: 128, 64>}]} {
    %c0 = arith.constant 0 : index
    %c0_0 = arith.constant 0 : index
    %0 = vector.load %arg1[%c0, %c0_0] : memref<128x288xf32, #tpu.memory_space<vmem>>, vector<128x288xf32>
    %c0_1 = arith.constant 0 : index
    %c0_2 = arith.constant 0 : index
    %1 = vector.load %arg2[%c0_1, %c0_2] : memref<288x64xf32, #tpu.memory_space<vmem>>, vector<288x64xf32>
    %cst = arith.constant dense<0.000000e+00> : vector<128x64xf32>
    %2 = tpu.matmul %0, %1, %cst {dimension_numbers = #tpu.dot_dimension_numbers<[1], [0], [0], [1], [0, 0, 1, 1], [], []>} : vector<128x288xf32>, vector<288x64xf32>, vector<128x64xf32> -> vector<128x64xf32>
    %c0_3 = arith.constant 0 : index
    %c0_4 = arith.constant 0 : index
    %3 = vector.load %arg3[%c0_3, %c0_4] : memref<1x64xf32, #tpu.memory_space<vmem>>, vector<1x64xf32>
    %4 = vector.broadcast %3 : vector<1x64xf32> to vector<128x64xf32>
    %5 = arith.addf %2, %4 : vector<128x64xf32>
    %cst_5 = arith.constant 0.000000e+00 : f32
    %6 = vector.broadcast %cst_5 : f32 to vector<128x64xf32>
    %7 = arith.maximumf %5, %6 : vector<128x64xf32>
    %c0_6 = arith.constant 0 : index
    %c0_7 = arith.constant 0 : index
    %8 = vector.load %arg4[%c0_6, %c0_7] : memref<128x64xf32, #tpu.memory_space<vmem>>, vector<128x64xf32>
    tpu.vector_store %arg4[%c0_6, %c0_7], %7 {strides = array<i32>} : memref<128x64xf32, #tpu.memory_space<vmem>>, vector<128x64xf32>,
    return
  }
  func.func @transform_0(%arg0: i32) -> (i32, i32) {
    %c0_i32 = arith.constant 0 : i32
    %c0_i32_0 = arith.constant 0 : i32
    return %arg0, %c0_i32 : i32, i32
  }
  func.func @transform_1(%arg0: i32) -> (i32, i32) {
    %c0_i32 = arith.constant 0 : i32
    %c0_i32_0 = arith.constant 0 : i32
    %c0_i32_1 = arith.constant 0 : i32
    return %c0_i32, %c0_i32_0 : i32, i32
  }
  func.func @transform_2(%arg0: i32) -> (i32, i32) {
    %c0_i32 = arith.constant 0 : i32
    %c0_i32_0 = arith.constant 0 : i32
    %c0_i32_1 = arith.constant 0 : i32
    return %c0_i32, %c0_i32_0 : i32, i32
  }
  func.func @transform_3(%arg0: i32) -> (i32, i32) {
    %c0_i32 = arith.constant 0 : i32
    %c0_i32_0 = arith.constant 0 : i32
    return %arg0, %c0_i32 : i32, i32
  }
}

module attributes {stable_mosaic.version = 11 : i64} {
  func.func @_linear_act_kernel(%arg0: i32, %arg1: memref<32x576xf32, #tpu.memory_space<vmem>>, %arg2: memref<576x128xf32, #tpu.memory_space<vmem>>, %arg3: memref<1x128xf32, #tpu.memory_space<vmem>>, %arg4: memref<32x128xf32, #tpu.memory_space<vmem>>) attributes {dimension_semantics = [#tpu.dimension_semantics<parallel>], iteration_bounds = array<i64: 1>, scalar_prefetch = 0 : i64, scratch_operands = 0 : i64, tpu.core_type = #tpu.core_type<tc>, window_params = [{transform_indices = @transform_0, window_bounds = array<i64: 32, 576>}, {pipeline_mode = #tpu.pipeline_mode<synchronous>, transform_indices = @transform_1, window_bounds = array<i64: 576, 128>}, {pipeline_mode = #tpu.pipeline_mode<synchronous>, transform_indices = @transform_2, window_bounds = array<i64: 1, 128>}, {transform_indices = @transform_3, window_bounds = array<i64: 32, 128>}]} {
    %c0 = arith.constant 0 : index
    %c0_0 = arith.constant 0 : index
    %0 = vector.load %arg1[%c0, %c0_0] : memref<32x576xf32, #tpu.memory_space<vmem>>, vector<32x576xf32>
    %c0_1 = arith.constant 0 : index
    %c0_2 = arith.constant 0 : index
    %1 = vector.load %arg2[%c0_1, %c0_2] : memref<576x128xf32, #tpu.memory_space<vmem>>, vector<576x128xf32>
    %cst = arith.constant dense<0.000000e+00> : vector<32x128xf32>
    %2 = tpu.matmul %0, %1, %cst {dimension_numbers = #tpu.dot_dimension_numbers<[1], [0], [0], [1], [0, 0, 1, 1], [], []>} : vector<32x576xf32>, vector<576x128xf32>, vector<32x128xf32> -> vector<32x128xf32>
    %c0_3 = arith.constant 0 : index
    %c0_4 = arith.constant 0 : index
    %3 = vector.load %arg3[%c0_3, %c0_4] : memref<1x128xf32, #tpu.memory_space<vmem>>, vector<1x128xf32>
    %4 = vector.broadcast %3 : vector<1x128xf32> to vector<32x128xf32>
    %5 = arith.addf %2, %4 : vector<32x128xf32>
    %cst_5 = arith.constant 0.000000e+00 : f32
    %6 = vector.broadcast %cst_5 : f32 to vector<32x128xf32>
    %7 = arith.maximumf %5, %6 : vector<32x128xf32>
    %c0_6 = arith.constant 0 : index
    %c0_7 = arith.constant 0 : index
    %8 = vector.load %arg4[%c0_6, %c0_7] : memref<32x128xf32, #tpu.memory_space<vmem>>, vector<32x128xf32>
    tpu.vector_store %arg4[%c0_6, %c0_7], %7 {strides = array<i32>} : memref<32x128xf32, #tpu.memory_space<vmem>>, vector<32x128xf32>,
    return
  }
  func.func @transform_0(%arg0: i32) -> (i32, i32) {
    %c0_i32 = arith.constant 0 : i32
    %c0_i32_0 = arith.constant 0 : i32
    return %arg0, %c0_i32 : i32, i32
  }
  func.func @transform_1(%arg0: i32) -> (i32, i32) {
    %c0_i32 = arith.constant 0 : i32
    %c0_i32_0 = arith.constant 0 : i32
    %c0_i32_1 = arith.constant 0 : i32
    return %c0_i32, %c0_i32_0 : i32, i32
  }
  func.func @transform_2(%arg0: i32) -> (i32, i32) {
    %c0_i32 = arith.constant 0 : i32
    %c0_i32_0 = arith.constant 0 : i32
    %c0_i32_1 = arith.constant 0 : i32
    return %c0_i32, %c0_i32_0 : i32, i32
  }
  func.func @transform_3(%arg0: i32) -> (i32, i32) {
    %c0_i32 = arith.constant 0 : i32
    %c0_i32_0 = arith.constant 0 : i32
    return %arg0, %c0_i32 : i32, i32
  }
}

module attributes {stable_mosaic.version = 11 : i64} {
  func.func @_mlp_head_kernel(%arg0: memref<2x512xf32, #tpu.memory_space<vmem>>, %arg1: memref<512x128xf32, #tpu.memory_space<vmem>>, %arg2: memref<1x128xf32, #tpu.memory_space<vmem>>, %arg3: memref<128x64xf32, #tpu.memory_space<vmem>>, %arg4: memref<1x64xf32, #tpu.memory_space<vmem>>, %arg5: memref<64x10xf32, #tpu.memory_space<vmem>>, %arg6: memref<1x10xf32, #tpu.memory_space<vmem>>, %arg7: memref<2x10xf32, #tpu.memory_space<vmem>>) attributes {dimension_semantics = [], scalar_prefetch = 0 : i64, scratch_operands = 0 : i64, tpu.core_type = #tpu.core_type<tc>} {
    %c0 = arith.constant 0 : index
    %c0_0 = arith.constant 0 : index
    %0 = vector.load %arg0[%c0, %c0_0] : memref<2x512xf32, #tpu.memory_space<vmem>>, vector<2x512xf32>
    %c0_1 = arith.constant 0 : index
    %c0_2 = arith.constant 0 : index
    %1 = vector.load %arg1[%c0_1, %c0_2] : memref<512x128xf32, #tpu.memory_space<vmem>>, vector<512x128xf32>
    %cst = arith.constant dense<0.000000e+00> : vector<2x128xf32>
    %2 = tpu.matmul %0, %1, %cst {dimension_numbers = #tpu.dot_dimension_numbers<[1], [0], [0], [1], [0, 0, 1, 1], [], []>} : vector<2x512xf32>, vector<512x128xf32>, vector<2x128xf32> -> vector<2x128xf32>
    %c0_3 = arith.constant 0 : index
    %c0_4 = arith.constant 0 : index
    %3 = vector.load %arg2[%c0_3, %c0_4] : memref<1x128xf32, #tpu.memory_space<vmem>>, vector<1x128xf32>
    %4 = vector.broadcast %3 : vector<1x128xf32> to vector<2x128xf32>
    %5 = arith.addf %2, %4 : vector<2x128xf32>
    %cst_5 = arith.constant 0.000000e+00 : f32
    %6 = vector.broadcast %cst_5 : f32 to vector<2x128xf32>
    %7 = arith.maximumf %5, %6 : vector<2x128xf32>
    %c0_6 = arith.constant 0 : index
    %c0_7 = arith.constant 0 : index
    %8 = vector.load %arg3[%c0_6, %c0_7] : memref<128x64xf32, #tpu.memory_space<vmem>>, vector<128x64xf32>
    %cst_8 = arith.constant dense<0.000000e+00> : vector<2x64xf32>
    %9 = tpu.matmul %7, %8, %cst_8 {dimension_numbers = #tpu.dot_dimension_numbers<[1], [0], [0], [1], [0, 0, 1, 1], [], []>} : vector<2x128xf32>, vector<128x64xf32>, vector<2x64xf32> -> vector<2x64xf32>
    %c0_9 = arith.constant 0 : index
    %c0_10 = arith.constant 0 : index
    %10 = vector.load %arg4[%c0_9, %c0_10] : memref<1x64xf32, #tpu.memory_space<vmem>>, vector<1x64xf32>
    %11 = vector.broadcast %10 : vector<1x64xf32> to vector<2x64xf32>
    %12 = arith.addf %9, %11 : vector<2x64xf32>
    %cst_11 = arith.constant 0.000000e+00 : f32
    %13 = vector.broadcast %cst_11 : f32 to vector<2x64xf32>
    %14 = arith.maximumf %12, %13 : vector<2x64xf32>
    %c0_12 = arith.constant 0 : index
    %c0_13 = arith.constant 0 : index
    %15 = vector.load %arg5[%c0_12, %c0_13] : memref<64x10xf32, #tpu.memory_space<vmem>>, vector<64x10xf32>
    %cst_14 = arith.constant dense<0.000000e+00> : vector<2x10xf32>
    %16 = tpu.matmul %14, %15, %cst_14 {dimension_numbers = #tpu.dot_dimension_numbers<[1], [0], [0], [1], [0, 0, 1, 1], [], []>} : vector<2x64xf32>, vector<64x10xf32>, vector<2x10xf32> -> vector<2x10xf32>
    %c0_15 = arith.constant 0 : index
    %c0_16 = arith.constant 0 : index
    %17 = vector.load %arg6[%c0_15, %c0_16] : memref<1x10xf32, #tpu.memory_space<vmem>>, vector<1x10xf32>
    %18 = vector.broadcast %17 : vector<1x10xf32> to vector<2x10xf32>
    %19 = arith.addf %16, %18 : vector<2x10xf32>
    %c0_17 = arith.constant 0 : index
    %c0_18 = arith.constant 0 : index
    %20 = vector.load %arg7[%c0_17, %c0_18] : memref<2x10xf32, #tpu.memory_space<vmem>>, vector<2x10xf32>
    tpu.vector_store %arg7[%c0_17, %c0_18], %19 {strides = array<i32>} : memref<2x10xf32, #tpu.memory_space<vmem>>, vector<2x10xf32>,
    return
  }
}

</mosaic_0001>

<bundles_post_ra>
// kernel: modified_lenet_forward.5
= control target key start
LH: loop header
LB: loop body
LE: loop exit
PB: predicated region body
PF: predicated region fallthrough
CT: control target
= control target key end

     0   :  { %s853_s12 = smov 0   ;;  %s1058_s0 = inlined_call_operand.vmem [shape: f32[512,27], index: 0, kind: input, shape index: {}]   ;;  %s1059_s1 = inlined_call_operand.vmem [shape: f32[27,16], index: 1, kind: input, shape index: {}]   ;;  %s1060_s2 = inlined_call_operand.vmem [shape: f32[1,16], index: 2, kind: input, shape index: {}]   ;;  %s1061_s3 = inlined_call_operand.vmem [shape: f32[512,16], index: 3, kind: output, shape index: {}]  }
   0x1 LB: > { %s664_s13 = sadd.s32 4294967295, %s830_s12   ;;  %p668_p0 = scmp.ge.s32.totalorder %s830_s12, 1  ;;  %s830_s12 = sphi %s853_s12, %s13_s12  }
   0x2   : > { %p138_p1 = scmp.lt.s32.totalorder %s830_s12, 3 }
   0x4   : > { %p139_p2 = pnand %p668_p0, %p138_p1 }
   0x5   : > { %v206_v0 = vld [vmem:[%s1059_s1] sm:$0xff] (!%p139_p2)  ;;  %v207_v1 = vld [vmem:[%s1059_s1 + $0x8] sm:$0xff] (!%p139_p2)  ;;  %v208_v2 = vld [vmem:[%s1059_s1 + $0x10] sm:$0xff] (!%p139_p2)  ;;  %vm314_vm0 = vcmask (!%p139_p2), 1042432   ;;  %s669_s20 = sshll.u32 (!%p139_p2), %s664_s13, 5  ;;  %vm832_vm1 = vmmov (!%p139_p2), 1  }
   0x6   : > { %142 = sbr.rel (%p139_p2) target bundleno = 265 (0x109), region = 32  ;;  %v801_v3 = vpack.c.bf16 (!%p139_p2), %v207_v1, %v206_v0  ;;  %v209_v4 = vld [vmem:[%s1059_s1 + $0x18] sm:$0x7] (!%p139_p2)  ;;  %p163_p3 = scmp.lt.s32.totalorder (!%p139_p2), %s669_s20, 63  ;;  %vm806_vm2 = vmpackc.low (!%p139_p2), %vm314_vm0, %vm832_vm1  ;;  %vm217_vm3 = vcmask (!%p139_p2), 220160   ;;  %vm575_vm4 = vcmask (!%p139_p2), 130048  }
   0x7   : > { %v805_v5 = vpack.c.bf16 (!%p139_p2), %v209_v4, %v208_v2  ;;  %v950_v38 = vld [vmem:[%s1060_s2] ss:$0 sm:$0xff] (!%p139_p2) }
   0x8   : > { %802 = vmatprep.subr.bf16.mxu0 (!%p139_p2), %v801_v3  ;;  %811 = vmatprep.subr.bf16.mxu1 (!%p139_p2), %v801_v3 }
   0x9   : > { %804 = vmatpush3.bf16.msra.mxu0 (!%p139_p2), %v801_v3  ;;  %813 = vmatpush3.bf16.msra.mxu1 (!%p139_p2), %v801_v3 }
   0xa   : > { %807 = vmatprep.subr.msk.bf16.mxu0 (!%p139_p2), %vm806_vm2, %v805_v5  ;;  %812 = vmatprep.subr.msk.bf16.mxu1 (!%p139_p2), %vm806_vm2, %v805_v5 }
   0xd   : > { %s1063_s20 = smov (!%p163_p3, %s669_s20), 63  ;;  %810 = vmatpush3.bf16.msk.msra.mxu0 %vm806_vm2, %v805_v5  ;;  %814 = vmatpush3.bf16.msk.msra.mxu1 %vm806_vm2, %v805_v5 }
   0xe   : > { %s670_s23 = sshll.u32 %s1063_s20, 3 }
   0xf   : > { %s881_s26 = scalar_lea.vmem %s1058_s0, %s670_s23  ;;  %s959_s4 = scalar_lea.vmem %s1061_s3, %s670_s23 }
  0x10   : > { %v174_v6 = vld [vmem:[%s881_s26] sm:$0xff]  ;;  %v175_v8 = vld [vmem:[%s881_s26 + $0x8] sm:$0xff]  ;;  %v176_v10 = vld [vmem:[%s881_s26 + $0x10] sm:$0xff] }
  0x11   : > { %v190_v7 = vld [vmem:[%s881_s26 + $0x80] sm:$0xff]  ;;  %v191_v9 = vld [vmem:[%s881_s26 + $0x88] sm:$0xff]  ;;  %753 = vmatprep.mubr.msk.f32.mxu0 %vm217_vm3, %v174_v6  ;;  %v192_v11 = vld [vmem:[%s881_s26 + $0x90] sm:$0xff] }
  0x12   : > { %777 = vmatprep.mubr.msk.f32.mxu1 %vm217_vm3, %v190_v7  ;;  %754 = vmatmul.mubr.msk.f32.vlgmr.msra.gmra.mrb[0].mxu0 %vm217_vm3, %v175_v8  ;;  %v177_v12 = vld [vmem:[%s881_s26 + $0x18] sm:$0xff]  ;;  %v178_v14 = vld [vmem:[%s881_s26 + $0x20] sm:$0xff]  ;;  %v179_v16 = vld [vmem:[%s881_s26 + $0x28] sm:$0xff] }
  0x13   : > { %778 = vmatmul.mubr.msk.f32.vlgmr.msra.gmra.mrb[0].mxu1 %vm217_vm3, %v191_v9  ;;  %756 = vmatprep.mubr.msk.f32.mxu0 %vm217_vm3, %v176_v10  ;;  %v193_v13 = vld [vmem:[%s881_s26 + $0x98] sm:$0xff]  ;;  %v194_v15 = vld [vmem:[%s881_s26 + $0xa0] sm:$0xff]  ;;  %v195_v17 = vld [vmem:[%s881_s26 + $0xa8] sm:$0xff] }
  0x14   : > { %780 = vmatprep.mubr.msk.f32.mxu1 %vm217_vm3, %v192_v11  ;;  %v180_v18 = vld [vmem:[%s881_s26 + $0x30] sm:$0xff]  ;;  %v181_v20 = vld [vmem:[%s881_s26 + $0x38] sm:$0xff]  ;;  %v182_v22 = vld [vmem:[%s881_s26 + $0x40] sm:$0xff] }
  0x15   : > { %v196_v19 = vld [vmem:[%s881_s26 + $0xb0] sm:$0xff]  ;;  %v197_v21 = vld [vmem:[%s881_s26 + $0xb8] sm:$0xff]  ;;  %v198_v23 = vld [vmem:[%s881_s26 + $0xc0] sm:$0xff] }
  0x16   : > { %757 = vmatmul.mubr.msk.f32.gmra.mrb[2].mxu0 %vm217_vm3, %v177_v12  ;;  %v183_v24 = vld [vmem:[%s881_s26 + $0x48] sm:$0xff]  ;;  %v184_v26 = vld [vmem:[%s881_s26 + $0x50] sm:$0xff]  ;;  %v185_v28 = vld [vmem:[%s881_s26 + $0x58] sm:$0xff] }
  0x17   : > { %781 = vmatmul.mubr.msk.f32.gmra.mrb[2].mxu1 %vm217_vm3, %v193_v13  ;;  %759 = vmatprep.mubr.msk.f32.mxu0 %vm217_vm3, %v178_v14  ;;  %v199_v25 = vld [vmem:[%s881_s26 + $0xc8] sm:$0xff]  ;;  %v200_v27 = vld [vmem:[%s881_s26 + $0xd0] sm:$0xff]  ;;  %v201_v29 = vld [vmem:[%s881_s26 + $0xd8] sm:$0xff] }
  0x18   : > { %783 = vmatprep.mubr.msk.f32.mxu1 %vm217_vm3, %v194_v15  ;;  %v186_v30 = vld [vmem:[%s881_s26 + $0x60] sm:$0xff]  ;;  %v187_v32 = vld [vmem:[%s881_s26 + $0x68] sm:$0xff]  ;;  %v188_v34 = vld [vmem:[%s881_s26 + $0x70] sm:$0xff] }
  0x19   : > { %v202_v31 = vld [vmem:[%s881_s26 + $0xe0] sm:$0xff]  ;;  %v203_v33 = vld [vmem:[%s881_s26 + $0xe8] sm:$0xff]  ;;  %v204_v35 = vld [vmem:[%s881_s26 + $0xf0] sm:$0xff] }
  0x1a   : > { %760 = vmatmul.mubr.msk.f32.gmra.mrb[4].mxu0 %vm217_vm3, %v179_v16  ;;  %v189_v36 = vld [vmem:[%s881_s26 + $0x78] sm:$0xff] }
  0x1b   : > { %784 = vmatmul.mubr.msk.f32.gmra.mrb[4].mxu1 %vm217_vm3, %v195_v17  ;;  %762 = vmatprep.mubr.msk.f32.mxu0 %vm217_vm3, %v180_v18  ;;  %v205_v37 = vld [vmem:[%s881_s26 + $0xf8] sm:$0xff] }
  0x1c   : > { %786 = vmatprep.mubr.msk.f32.mxu1 %vm217_vm3, %v196_v19 }
  0x1e   : > { %763 = vmatmul.mubr.msk.f32.gmra.mrb[6].mxu0 %vm217_vm3, %v181_v20 }
  0x1f   : > { %787 = vmatmul.mubr.msk.f32.gmra.mrb[6].mxu1 %vm217_vm3, %v197_v21  ;;  %765 = vmatprep.mubr.msk.f32.mxu0 %vm217_vm3, %v182_v22 }
  0x20   : > { %789 = vmatprep.mubr.msk.f32.mxu1 %vm217_vm3, %v198_v23 }
  0x22   : > { %766 = vmatmul.mubr.msk.f32.gmra.mrb[8].mxu0 %vm217_vm3, %v183_v24 }
  0x23   : > { %790 = vmatmul.mubr.msk.f32.gmra.mrb[8].mxu1 %vm217_vm3, %v199_v25  ;;  %768 = vmatprep.mubr.msk.f32.mxu0 %vm217_vm3, %v184_v26 }
  0x24   : > { %792 = vmatprep.mubr.msk.f32.mxu1 %vm217_vm3, %v200_v27 }
  0x26   : > { %769 = vmatmul.mubr.msk.f32.gmra.mrb[10].mxu0 %vm217_vm3, %v185_v28 }
  0x27   : > { %793 = vmatmul.mubr.msk.f32.gmra.mrb[10].mxu1 %vm217_vm3, %v201_v29  ;;  %771 = vmatprep.mubr.msk.f32.mxu0 %vm217_vm3, %v186_v30 }
  0x28   : > { %795 = vmatprep.mubr.msk.f32.mxu1 %vm217_vm3, %v202_v31 }
  0x2a   : > { %772 = vmatmul.mubr.msk.f32.gmra.mrb[12].mxu0 %vm217_vm3, %v187_v32 }
  0x2b   : > { %796 = vmatmul.mubr.msk.f32.gmra.mrb[12].mxu1 %vm217_vm3, %v203_v33  ;;  %774 = vmatprep.mubr.msk.f32.mxu0 %vm217_vm3, %v188_v34 }
  0x2c   : > { %798 = vmatprep.mubr.msk.f32.mxu1 %vm217_vm3, %v204_v35 }
  0x2e   : > { %775 = vmatmul.mubr.msk.f32.gmra.mrb[14].mxu0 %vm217_vm3, %v189_v36 }
  0x2f   : > { %799 = vmatmul.mubr.msk.f32.gmra.mrb[14].mxu1 %vm217_vm3, %v205_v37 }
  0xe5   : > { %v755_v39 = vpop.f32.mrb[0].mxu0 }
  0xe6   : > { %v779_v40 = vpop.f32.mrb[0].mxu1  ;;  %v390_v41 = vadd.f32 %v755_v39, %v950_v38  ;;  %v384_v43 = vpop.f32.mrb[1].mxu0 }
  0xe7   : > { %v470_v42 = vadd.f32 %v779_v40, %v950_v38  ;;  %v464_v44 = vpop.f32.mrb[1].mxu1  ;;  %v385_v45 = vadd.f32 %v950_v38, %v384_v43 }
  0xe8   : > { %v465_v46 = vadd.f32 %v950_v38, %v464_v44  ;;  %v544_v47 = vmax.f32 %v390_v41, 0.0 }
  0xe9   : > { %v560_v48 = vmax.f32 %v470_v42, 0.0  ;;  %v543_v49 = vmax.f32 %v385_v45, 0.0  ;;  %v758_v51 = vpop.f32.mrb[2].mxu0 }
  0xea   : > { %v559_v50 = vmax.f32 %v465_v46, 0.0  ;;  %v782_v52 = vpop.f32.mrb[2].mxu1  ;;  %577 = vst.msk [vmem:[%s959_s4 + $0x8] sm:$0xff] %vm575_vm4, %v544_v47  ;;  %v400_v53 = vadd.f32 %v758_v51, %v950_v38  ;;  %v394_v55 = vpop.f32.mrb[3].mxu0 }
  0xeb   : > { %593 = vst.msk [vmem:[%s959_s4 + $0x88] sm:$0xff] %vm575_vm4, %v560_v48  ;;  %v480_v54 = vadd.f32 %v782_v52, %v950_v38  ;;  %v474_v56 = vpop.f32.mrb[3].mxu1  ;;  %576 = vst.msk [vmem:[%s959_s4] sm:$0xff] %vm575_vm4, %v543_v49  ;;  %v395_v57 = vadd.f32 %v950_v38, %v394_v55 }
  0xec   : > { %592 = vst.msk [vmem:[%s959_s4 + $0x80] sm:$0xff] %vm575_vm4, %v559_v50  ;;  %v475_v58 = vadd.f32 %v950_v38, %v474_v56  ;;  %v546_v59 = vmax.f32 %v400_v53, 0.0 }
  0xed   : > { %v562_v60 = vmax.f32 %v480_v54, 0.0  ;;  %v545_v61 = vmax.f32 %v395_v57, 0.0  ;;  %v761_v63 = vpop.f32.mrb[4].mxu0 }
  0xee   : > { %v561_v62 = vmax.f32 %v475_v58, 0.0  ;;  %v785_v0 = vpop.f32.mrb[4].mxu1  ;;  %579 = vst.msk [vmem:[%s959_s4 + $0x18] sm:$0xff] %vm575_vm4, %v546_v59  ;;  %v410_v1 = vadd.f32 %v761_v63, %v950_v38  ;;  %v404_v3 = vpop.f32.mrb[5].mxu0 }
  0xef   : > { %595 = vst.msk [vmem:[%s959_s4 + $0x98] sm:$0xff] %vm575_vm4, %v562_v60  ;;  %v490_v2 = vadd.f32 %v785_v0, %v950_v38  ;;  %v484_v4 = vpop.f32.mrb[5].mxu1  ;;  %578 = vst.msk [vmem:[%s959_s4 + $0x10] sm:$0xff] %vm575_vm4, %v545_v61  ;;  %v405_v5 = vadd.f32 %v950_v38, %v404_v3 }
  0xf0   : > { %594 = vst.msk [vmem:[%s959_s4 + $0x90] sm:$0xff] %vm575_vm4, %v561_v62  ;;  %v485_v6 = vadd.f32 %v950_v38, %v484_v4  ;;  %v548_v7 = vmax.f32 %v410_v1, 0.0 }
  0xf1   : > { %v564_v8 = vmax.f32 %v490_v2, 0.0  ;;  %v547_v9 = vmax.f32 %v405_v5, 0.0  ;;  %v764_v11 = vpop.f32.mrb[6].mxu0 }
  0xf2   : > { %v563_v10 = vmax.f32 %v485_v6, 0.0  ;;  %v788_v12 = vpop.f32.mrb[6].mxu1  ;;  %581 = vst.msk [vmem:[%s959_s4 + $0x28] sm:$0xff] %vm575_vm4, %v548_v7  ;;  %v420_v13 = vadd.f32 %v764_v11, %v950_v38  ;;  %v414_v15 = vpop.f32.mrb[7].mxu0 }
  0xf3   : > { %597 = vst.msk [vmem:[%s959_s4 + $0xa8] sm:$0xff] %vm575_vm4, %v564_v8  ;;  %v500_v14 = vadd.f32 %v788_v12, %v950_v38  ;;  %v494_v16 = vpop.f32.mrb[7].mxu1  ;;  %580 = vst.msk [vmem:[%s959_s4 + $0x20] sm:$0xff] %vm575_vm4, %v547_v9  ;;  %v415_v17 = vadd.f32 %v950_v38, %v414_v15 }
  0xf4   : > { %596 = vst.msk [vmem:[%s959_s4 + $0xa0] sm:$0xff] %vm575_vm4, %v563_v10  ;;  %v495_v18 = vadd.f32 %v950_v38, %v494_v16  ;;  %v550_v19 = vmax.f32 %v420_v13, 0.0 }
  0xf5   : > { %v566_v20 = vmax.f32 %v500_v14, 0.0  ;;  %v549_v21 = vmax.f32 %v415_v17, 0.0  ;;  %v767_v23 = vpop.f32.mrb[8].mxu0 }
  0xf6   : > { %v565_v22 = vmax.f32 %v495_v18, 0.0  ;;  %v791_v24 = vpop.f32.mrb[8].mxu1  ;;  %583 = vst.msk [vmem:[%s959_s4 + $0x38] sm:$0xff] %vm575_vm4, %v550_v19  ;;  %v430_v25 = vadd.f32 %v767_v23, %v950_v38  ;;  %v424_v27 = vpop.f32.mrb[9].mxu0 }
  0xf7   : > { %599 = vst.msk [vmem:[%s959_s4 + $0xb8] sm:$0xff] %vm575_vm4, %v566_v20  ;;  %v510_v26 = vadd.f32 %v791_v24, %v950_v38  ;;  %v504_v28 = vpop.f32.mrb[9].mxu1  ;;  %582 = vst.msk [vmem:[%s959_s4 + $0x30] sm:$0xff] %vm575_vm4, %v549_v21  ;;  %v425_v29 = vadd.f32 %v950_v38, %v424_v27 }
  0xf8   : > { %598 = vst.msk [vmem:[%s959_s4 + $0xb0] sm:$0xff] %vm575_vm4, %v565_v22  ;;  %v505_v30 = vadd.f32 %v950_v38, %v504_v28  ;;  %v552_v31 = vmax.f32 %v430_v25, 0.0 }
  0xf9   : > { %v568_v32 = vmax.f32 %v510_v26, 0.0  ;;  %v551_v33 = vmax.f32 %v425_v29, 0.0  ;;  %v770_v35 = vpop.f32.mrb[10].mxu0 }
  0xfa   : > { %v567_v34 = vmax.f32 %v505_v30, 0.0  ;;  %v794_v36 = vpop.f32.mrb[10].mxu1  ;;  %585 = vst.msk [vmem:[%s959_s4 + $0x48] sm:$0xff] %vm575_vm4, %v552_v31  ;;  %v440_v37 = vadd.f32 %v770_v35, %v950_v38  ;;  %v434_v40 = vpop.f32.mrb[11].mxu0 }
  0xfb   : > { %601 = vst.msk [vmem:[%s959_s4 + $0xc8] sm:$0xff] %vm575_vm4, %v568_v32  ;;  %v520_v39 = vadd.f32 %v794_v36, %v950_v38  ;;  %v514_v41 = vpop.f32.mrb[11].mxu1  ;;  %584 = vst.msk [vmem:[%s959_s4 + $0x40] sm:$0xff] %vm575_vm4, %v551_v33  ;;  %v435_v42 = vadd.f32 %v950_v38, %v434_v40 }
  0xfc   : > { %600 = vst.msk [vmem:[%s959_s4 + $0xc0] sm:$0xff] %vm575_vm4, %v567_v34  ;;  %v515_v43 = vadd.f32 %v950_v38, %v514_v41  ;;  %v554_v44 = vmax.f32 %v440_v37, 0.0 }
  0xfd   : > { %v570_v45 = vmax.f32 %v520_v39, 0.0  ;;  %v553_v46 = vmax.f32 %v435_v42, 0.0  ;;  %v773_v48 = vpop.f32.mrb[12].mxu0 }
  0xfe   : > { %v569_v47 = vmax.f32 %v515_v43, 0.0  ;;  %v797_v49 = vpop.f32.mrb[12].mxu1  ;;  %587 = vst.msk [vmem:[%s959_s4 + $0x58] sm:$0xff] %vm575_vm4, %v554_v44  ;;  %v450_v50 = vadd.f32 %v773_v48, %v950_v38  ;;  %v444_v52 = vpop.f32.mrb[13].mxu0 }
  0xff   : > { %603 = vst.msk [vmem:[%s959_s4 + $0xd8] sm:$0xff] %vm575_vm4, %v570_v45  ;;  %v530_v51 = vadd.f32 %v797_v49, %v950_v38  ;;  %v524_v53 = vpop.f32.mrb[13].mxu1  ;;  %586 = vst.msk [vmem:[%s959_s4 + $0x50] sm:$0xff] %vm575_vm4, %v553_v46  ;;  %v445_v54 = vadd.f32 %v950_v38, %v444_v52 }
 0x100   : > { %602 = vst.msk [vmem:[%s959_s4 + $0xd0] sm:$0xff] %vm575_vm4, %v569_v47  ;;  %v525_v55 = vadd.f32 %v950_v38, %v524_v53  ;;  %v556_v56 = vmax.f32 %v450_v50, 0.0 }
 0x101   : > { %v572_v57 = vmax.f32 %v530_v51, 0.0  ;;  %v555_v58 = vmax.f32 %v445_v54, 0.0  ;;  %v776_v60 = vpop.f32.mrb[14].mxu0 }
 0x102   : > { %v571_v59 = vmax.f32 %v525_v55, 0.0  ;;  %v800_v61 = vpop.f32.mrb[14].mxu1  ;;  %589 = vst.msk [vmem:[%s959_s4 + $0x68] sm:$0xff] %vm575_vm4, %v556_v56  ;;  %v460_v62 = vadd.f32 %v776_v60, %v950_v38  ;;  %v454_v0 = vpop.f32.mrb[15].mxu0 }
 0x103   : > { %605 = vst.msk [vmem:[%s959_s4 + $0xe8] sm:$0xff] %vm575_vm4, %v572_v57  ;;  %v540_v63 = vadd.f32 %v800_v61, %v950_v38  ;;  %v534_v1 = vpop.f32.mrb[15].mxu1  ;;  %588 = vst.msk [vmem:[%s959_s4 + $0x60] sm:$0xff] %vm575_vm4, %v555_v58  ;;  %v455_v2 = vadd.f32 %v950_v38, %v454_v0 }
 0x104   : > { %604 = vst.msk [vmem:[%s959_s4 + $0xe0] sm:$0xff] %vm575_vm4, %v571_v59  ;;  %v535_v3 = vadd.f32 %v950_v38, %v534_v1  ;;  %v558_v4 = vmax.f32 %v460_v62, 0.0 }
 0x105   : > { %v574_v5 = vmax.f32 %v540_v63, 0.0  ;;  %v557_v6 = vmax.f32 %v455_v2, 0.0 }
 0x106   : > { %v573_v7 = vmax.f32 %v535_v3, 0.0  ;;  %591 = vst.msk [vmem:[%s959_s4 + $0x78] sm:$0xff] %vm575_vm4, %v558_v4 }
 0x107   : > { %607 = vst.msk [vmem:[%s959_s4 + $0xf8] sm:$0xff] %vm575_vm4, %v574_v5  ;;  %590 = vst.msk [vmem:[%s959_s4 + $0x70] sm:$0xff] %vm575_vm4, %v557_v6 }
 0x108   : > { %606 = vst.msk [vmem:[%s959_s4 + $0xf0] sm:$0xff] %vm575_vm4, %v573_v7 }
 0x109 PF: > { %s13_s12 = sadd.s32 1, %s830_s12  }
 0x10a   : > { %p10_p4 = scmp.ge.s32.totalorder %s13_s12, 4  }
 0x10c   :  { %12 = sbr.rel (!%p10_p4) target bundleno = 1 (0x1), region = 62 }

// kernel: modified_lenet_forward.6
= control target key start
LH: loop header
LB: loop body
LE: loop exit
PB: predicated region body
PF: predicated region fallthrough
CT: control target
= control target key end

     0   :  { %v365_v0 = vmov 0.0|0.0   ;;  %vm71_vm0 = vcmask 130048   ;;  %vm281_vm1 = vcmask 261120   ;;  %s655_s1 = inlined_call_operand.vmem [shape: f32[144,32], index: 1, kind: input, shape index: {}]   ;;  %s656_s0 = inlined_call_operand.vmem [shape: f32[128,144], index: 0, kind: input, shape index: {}]   ;;  %s657_s2 = inlined_call_operand.vmem [shape: f32[1,32], index: 2, kind: input, shape index: {}]   ;;  %s658_s3 = inlined_call_operand.vmem [shape: f32[128,32], index: 3, kind: output, shape index: {}]  }
   0x1   :  { %319 = vmatprep.subr.bf16.mxu0 %v365_v0  ;;  %346 = vmatprep.subr.bf16.mxu1 %v365_v0  ;;  %v46_v1 = vld [vmem:[%s655_s1] sm:$0xff]  ;;  %v47_v2 = vld [vmem:[%s655_s1 + $0x8] sm:$0xff]  ;;  %v48_v3 = vld [vmem:[%s655_s1 + $0x10] sm:$0xff] }
   0x2   :  { %v320_v4 = vpack.c.bf16 %v47_v2, %v46_v1  ;;  %v49_v5 = vld [vmem:[%s655_s1 + $0x18] sm:$0xff]  ;;  %v50_v7 = vld [vmem:[%s655_s1 + $0x20] sm:$0xff]  ;;  %v51_v8 = vld [vmem:[%s655_s1 + $0x28] sm:$0xff] }
   0x3   :  { %v323_v6 = vpack.c.bf16 %v49_v5, %v48_v3  ;;  %v15_v9 = vld [vmem:[%s656_s0 + $0x8] sm:$0xff]  ;;  %v326_v11 = vpack.c.bf16 %v51_v8, %v50_v7  ;;  %v52_v12 = vld [vmem:[%s655_s1 + $0x30] sm:$0xff]  ;;  %v53_v13 = vld [vmem:[%s655_s1 + $0x38] sm:$0xff] }
   0x4   :  { %321 = vmatpush1.bf16.msra.mxu0 %v320_v4  ;;  %355 = vmatpush1.bf16.msra.mxu1 %v320_v4  ;;  %v31_v10 = vld [vmem:[%s656_s0 + $0x88] sm:$0xff]  ;;  %v329_v14 = vpack.c.bf16 %v53_v13, %v52_v12  ;;  %v54_v15 = vld [vmem:[%s655_s1 + $0x40] sm:$0xff]  ;;  %v56_v18 = vld [vmem:[%s655_s1 + $0x50] sm:$0xff] }
   0x5   :  { %322 = vmatprep.subr.bf16.mxu0 %v365_v0  ;;  %347 = vmatprep.subr.bf16.mxu1 %v365_v0  ;;  %v55_v16 = vld [vmem:[%s655_s1 + $0x48] sm:$0xff]  ;;  %v57_v19 = vld [vmem:[%s655_s1 + $0x58] sm:$0xff]  ;;  %v58_v21 = vld [vmem:[%s655_s1 + $0x60] sm:$0xff] }
   0x6   :  { %303 = vmatprep.mubr.msk.f32.mxu0 %vm71_vm0, %v15_v9  ;;  %311 = vmatprep.mubr.msk.f32.mxu1 %vm71_vm0, %v31_v10  ;;  %v332_v17 = vpack.c.bf16 %v55_v16, %v54_v15  ;;  %v335_v20 = vpack.c.bf16 %v57_v19, %v56_v18  ;;  %v59_v22 = vld [vmem:[%s655_s1 + $0x68] sm:$0xff]  ;;  %v60_v24 = vld [vmem:[%s655_s1 + $0x70] sm:$0xff]  ;;  %v61_v25 = vld [vmem:[%s655_s1 + $0x78] sm:$0xff] }
   0x7   :  { %v338_v23 = vpack.c.bf16 %v59_v22, %v58_v21  ;;  %v341_v26 = vpack.c.bf16 %v61_v25, %v60_v24  ;;  %v62_v27 = vld [vmem:[%s655_s1 + $0x80] sm:$0xff]  ;;  %v63_v28 = vld [vmem:[%s655_s1 + $0x88] sm:$0xff]  ;;  %v17_v32 = vld [vmem:[%s656_s0 + $0x18] sm:$0xff] }
   0x8   :  { %324 = vmatpush1.bf16.msra.mxu0 %v323_v6  ;;  %356 = vmatpush1.bf16.msra.mxu1 %v323_v6  ;;  %v344_v29 = vpack.c.bf16 %v63_v28, %v62_v27  ;;  %v14_v30 = vld [vmem:[%s656_s0] sm:$0xff]  ;;  %v33_v33 = vld [vmem:[%s656_s0 + $0x98] sm:$0xff]  ;;  %v16_v34 = vld [vmem:[%s656_s0 + $0x10] sm:$0xff] }
   0x9   :  { %325 = vmatprep.subr.bf16.mxu0 %v365_v0  ;;  %348 = vmatprep.subr.bf16.mxu1 %v365_v0  ;;  %v30_v31 = vld [vmem:[%s656_s0 + $0x80] sm:$0xff]  ;;  %v32_v35 = vld [vmem:[%s656_s0 + $0x90] sm:$0xff]  ;;  %v19_v36 = vld [vmem:[%s656_s0 + $0x28] sm:$0xff] }
   0xa   :  { %v35_v37 = vld [vmem:[%s656_s0 + $0xa8] sm:$0xff]  ;;  %v18_v38 = vld [vmem:[%s656_s0 + $0x20] sm:$0xff]  ;;  %v21_v40 = vld [vmem:[%s656_s0 + $0x38] sm:$0xff] }
   0xb   :  { %v34_v39 = vld [vmem:[%s656_s0 + $0xa0] sm:$0xff]  ;;  %v37_v41 = vld [vmem:[%s656_s0 + $0xb8] sm:$0xff]  ;;  %v20_v42 = vld [vmem:[%s656_s0 + $0x30] sm:$0xff] }
   0xc   :  { %327 = vmatpush1.bf16.msra.mxu0 %v326_v11  ;;  %357 = vmatpush1.bf16.msra.mxu1 %v326_v11  ;;  %v36_v43 = vld [vmem:[%s656_s0 + $0xb0] sm:$0xff]  ;;  %v23_v44 = vld [vmem:[%s656_s0 + $0x48] sm:$0xff]  ;;  %v22_v46 = vld [vmem:[%s656_s0 + $0x40] sm:$0xff] }
   0xd   :  { %328 = vmatprep.subr.bf16.mxu0 %v365_v0  ;;  %349 = vmatprep.subr.bf16.mxu1 %v365_v0  ;;  %v39_v45 = vld [vmem:[%s656_s0 + $0xc8] sm:$0xff]  ;;  %v38_v47 = vld [vmem:[%s656_s0 + $0xc0] sm:$0xff]  ;;  %v25_v48 = vld [vmem:[%s656_s0 + $0x58] sm:$0xff] }
   0xe   :  { %v41_v49 = vld [vmem:[%s656_s0 + $0xd8] sm:$0xff]  ;;  %v24_v50 = vld [vmem:[%s656_s0 + $0x50] sm:$0xff]  ;;  %v27_v52 = vld [vmem:[%s656_s0 + $0x68] sm:$0xff] }
   0xf   :  { %v40_v51 = vld [vmem:[%s656_s0 + $0xd0] sm:$0xff]  ;;  %v43_v53 = vld [vmem:[%s656_s0 + $0xe8] sm:$0xff]  ;;  %v26_v54 = vld [vmem:[%s656_s0 + $0x60] sm:$0xff] }
  0x10   :  { %330 = vmatpush1.bf16.msra.mxu0 %v329_v14  ;;  %358 = vmatpush1.bf16.msra.mxu1 %v329_v14  ;;  %v42_v55 = vld [vmem:[%s656_s0 + $0xe0] sm:$0xff]  ;;  %v29_v56 = vld [vmem:[%s656_s0 + $0x78] sm:$0xff]  ;;  %v28_v58 = vld [vmem:[%s656_s0 + $0x70] sm:$0xff] }
  0x11   :  { %331 = vmatprep.subr.bf16.mxu0 %v365_v0  ;;  %350 = vmatprep.subr.bf16.mxu1 %v365_v0  ;;  %v45_v57 = vld [vmem:[%s656_s0 + $0xf8] sm:$0xff]  ;;  %v44_v59 = vld [vmem:[%s656_s0 + $0xf0] sm:$0xff]  ;;  %v573_v60 = vld [vmem:[%s657_s2] ss:$0 sm:$0xff] }
  0x14   :  { %333 = vmatpush1.bf16.msra.mxu0 %v332_v17  ;;  %359 = vmatpush1.bf16.msra.mxu1 %v332_v17 }
  0x15   :  { %334 = vmatprep.subr.bf16.mxu0 %v365_v0  ;;  %351 = vmatprep.subr.bf16.mxu1 %v365_v0 }
  0x18   :  { %336 = vmatpush1.bf16.msra.mxu0 %v335_v20  ;;  %360 = vmatpush1.bf16.msra.mxu1 %v335_v20 }
  0x19   :  { %337 = vmatprep.subr.bf16.mxu0 %v365_v0  ;;  %352 = vmatprep.subr.bf16.mxu1 %v365_v0 }
  0x1c   :  { %339 = vmatpush1.bf16.msra.mxu0 %v338_v23  ;;  %361 = vmatpush1.bf16.msra.mxu1 %v338_v23 }
  0x1d   :  { %340 = vmatprep.subr.bf16.mxu0 %v365_v0  ;;  %353 = vmatprep.subr.bf16.mxu1 %v365_v0 }
  0x20   :  { %342 = vmatpush1.bf16.msra.mxu0 %v341_v26  ;;  %362 = vmatpush1.bf16.msra.mxu1 %v341_v26 }
  0x21   :  { %343 = vmatprep.subr.bf16.mxu0 %v365_v0  ;;  %354 = vmatprep.subr.bf16.mxu1 %v365_v0 }
  0x24   :  { %345 = vmatpush1.bf16.msra.mxu0 %v344_v29  ;;  %363 = vmatpush1.bf16.msra.mxu1 %v344_v29 }
  0x27   :  { %185 = vmatmul.mubr.f32.vlgmr.msra.gmra.mrb[0].mxu0 %v14_v30  ;;  %225 = vmatmul.mubr.f32.vlgmr.msra.gmra.mrb[0].mxu1 %v30_v31 }
  0x28   :  { %304 = vmatprep.mubr.msk.f32.mxu0 %vm71_vm0, %v17_v32  ;;  %312 = vmatprep.mubr.msk.f32.mxu1 %vm71_vm0, %v33_v33 }
  0x2b   :  { %190 = vmatmul.mubr.f32.gmra.mrb[2].mxu0 %v16_v34  ;;  %230 = vmatmul.mubr.f32.gmra.mrb[2].mxu1 %v32_v35 }
  0x2c   :  { %305 = vmatprep.mubr.msk.f32.mxu0 %vm71_vm0, %v19_v36  ;;  %313 = vmatprep.mubr.msk.f32.mxu1 %vm71_vm0, %v35_v37 }
  0x2f   :  { %195 = vmatmul.mubr.f32.gmra.mrb[4].mxu0 %v18_v38  ;;  %235 = vmatmul.mubr.f32.gmra.mrb[4].mxu1 %v34_v39 }
  0x30   :  { %306 = vmatprep.mubr.msk.f32.mxu0 %vm71_vm0, %v21_v40  ;;  %314 = vmatprep.mubr.msk.f32.mxu1 %vm71_vm0, %v37_v41 }
  0x33   :  { %200 = vmatmul.mubr.f32.gmra.mrb[6].mxu0 %v20_v42  ;;  %240 = vmatmul.mubr.f32.gmra.mrb[6].mxu1 %v36_v43 }
  0x34   :  { %307 = vmatprep.mubr.msk.f32.mxu0 %vm71_vm0, %v23_v44  ;;  %315 = vmatprep.mubr.msk.f32.mxu1 %vm71_vm0, %v39_v45 }
  0x37   :  { %205 = vmatmul.mubr.f32.gmra.mrb[8].mxu0 %v22_v46  ;;  %245 = vmatmul.mubr.f32.gmra.mrb[8].mxu1 %v38_v47 }
  0x38   :  { %308 = vmatprep.mubr.msk.f32.mxu0 %vm71_vm0, %v25_v48  ;;  %316 = vmatprep.mubr.msk.f32.mxu1 %vm71_vm0, %v41_v49 }
  0x3b   :  { %210 = vmatmul.mubr.f32.gmra.mrb[10].mxu0 %v24_v50  ;;  %250 = vmatmul.mubr.f32.gmra.mrb[10].mxu1 %v40_v51 }
  0x3c   :  { %309 = vmatprep.mubr.msk.f32.mxu0 %vm71_vm0, %v27_v52  ;;  %317 = vmatprep.mubr.msk.f32.mxu1 %vm71_vm0, %v43_v53 }
  0x3f   :  { %215 = vmatmul.mubr.f32.gmra.mrb[12].mxu0 %v26_v54  ;;  %255 = vmatmul.mubr.f32.gmra.mrb[12].mxu1 %v42_v55 }
  0x40   :  { %310 = vmatprep.mubr.msk.f32.mxu0 %vm71_vm0, %v29_v56  ;;  %318 = vmatprep.mubr.msk.f32.mxu1 %vm71_vm0, %v45_v57 }
  0x43   :  { %220 = vmatmul.mubr.f32.gmra.mrb[14].mxu0 %v28_v58  ;;  %260 = vmatmul.mubr.f32.gmra.mrb[14].mxu1 %v44_v59 }
  0xfa   :  { %v186_v61 = vpop.f32.mrb[0].mxu0  ;;  %v226_v62 = vpop.f32.mrb[0].mxu1 }
  0xfb   :  { %v187_v63 = vadd.f32 %v573_v60, %v186_v61  ;;  %v227_v0 = vadd.f32 %v573_v60, %v226_v62  ;;  %v188_v1 = vpop.f32.mrb[1].mxu0  ;;  %v228_v2 = vpop.f32.mrb[1].mxu1 }
  0xfd   :  { %v265_v3 = vmax.f32 %v187_v63, 0.0  ;;  %v273_v4 = vmax.f32 %v227_v0, 0.0 }
  0xfe   :  { %v191_v5 = vpop.f32.mrb[2].mxu0  ;;  %v231_v6 = vpop.f32.mrb[2].mxu1 }
  0xff   :  { %282 = vst.msk [vmem:[%s658_s3] sm:$0xff] %vm281_vm1, %v265_v3  ;;  %290 = vst.msk [vmem:[%s658_s3 + $0x40] sm:$0xff] %vm281_vm1, %v273_v4  ;;  %v192_v7 = vadd.f32 %v573_v60, %v191_v5  ;;  %v232_v8 = vadd.f32 %v573_v60, %v231_v6  ;;  %v193_v9 = vpop.f32.mrb[3].mxu0  ;;  %v233_v10 = vpop.f32.mrb[3].mxu1 }
 0x101   :  { %v266_v11 = vmax.f32 %v192_v7, 0.0  ;;  %v274_v12 = vmax.f32 %v232_v8, 0.0 }
 0x102   :  { %v196_v13 = vpop.f32.mrb[4].mxu0  ;;  %v236_v14 = vpop.f32.mrb[4].mxu1 }
 0x103   :  { %283 = vst.msk [vmem:[%s658_s3 + $0x8] sm:$0xff] %vm281_vm1, %v266_v11  ;;  %291 = vst.msk [vmem:[%s658_s3 + $0x48] sm:$0xff] %vm281_vm1, %v274_v12  ;;  %v197_v15 = vadd.f32 %v573_v60, %v196_v13  ;;  %v237_v16 = vadd.f32 %v573_v60, %v236_v14  ;;  %v198_v17 = vpop.f32.mrb[5].mxu0  ;;  %v238_v18 = vpop.f32.mrb[5].mxu1 }
 0x105   :  { %v267_v19 = vmax.f32 %v197_v15, 0.0  ;;  %v275_v20 = vmax.f32 %v237_v16, 0.0 }
 0x106   :  { %v201_v21 = vpop.f32.mrb[6].mxu0  ;;  %v241_v22 = vpop.f32.mrb[6].mxu1 }
 0x107   :  { %284 = vst.msk [vmem:[%s658_s3 + $0x10] sm:$0xff] %vm281_vm1, %v267_v19  ;;  %292 = vst.msk [vmem:[%s658_s3 + $0x50] sm:$0xff] %vm281_vm1, %v275_v20  ;;  %v202_v23 = vadd.f32 %v573_v60, %v201_v21  ;;  %v242_v24 = vadd.f32 %v573_v60, %v241_v22  ;;  %v203_v25 = vpop.f32.mrb[7].mxu0  ;;  %v243_v26 = vpop.f32.mrb[7].mxu1 }
 0x109   :  { %v268_v27 = vmax.f32 %v202_v23, 0.0  ;;  %v276_v28 = vmax.f32 %v242_v24, 0.0 }
 0x10a   :  { %v206_v29 = vpop.f32.mrb[8].mxu0  ;;  %v246_v30 = vpop.f32.mrb[8].mxu1 }
 0x10b   :  { %285 = vst.msk [vmem:[%s658_s3 + $0x18] sm:$0xff] %vm281_vm1, %v268_v27  ;;  %293 = vst.msk [vmem:[%s658_s3 + $0x58] sm:$0xff] %vm281_vm1, %v276_v28  ;;  %v207_v31 = vadd.f32 %v573_v60, %v206_v29  ;;  %v247_v32 = vadd.f32 %v573_v60, %v246_v30  ;;  %v208_v33 = vpop.f32.mrb[9].mxu0  ;;  %v248_v34 = vpop.f32.mrb[9].mxu1 }
 0x10d   :  { %v269_v35 = vmax.f32 %v207_v31, 0.0  ;;  %v277_v36 = vmax.f32 %v247_v32, 0.0 }
 0x10e   :  { %v211_v37 = vpop.f32.mrb[10].mxu0  ;;  %v251_v38 = vpop.f32.mrb[10].mxu1 }
 0x10f   :  { %286 = vst.msk [vmem:[%s658_s3 + $0x20] sm:$0xff] %vm281_vm1, %v269_v35  ;;  %294 = vst.msk [vmem:[%s658_s3 + $0x60] sm:$0xff] %vm281_vm1, %v277_v36  ;;  %v212_v39 = vadd.f32 %v573_v60, %v211_v37  ;;  %v252_v40 = vadd.f32 %v573_v60, %v251_v38  ;;  %v213_v41 = vpop.f32.mrb[11].mxu0  ;;  %v253_v42 = vpop.f32.mrb[11].mxu1 }
 0x111   :  { %v270_v43 = vmax.f32 %v212_v39, 0.0  ;;  %v278_v44 = vmax.f32 %v252_v40, 0.0 }
 0x112   :  { %v216_v45 = vpop.f32.mrb[12].mxu0  ;;  %v256_v46 = vpop.f32.mrb[12].mxu1 }
 0x113   :  { %287 = vst.msk [vmem:[%s658_s3 + $0x28] sm:$0xff] %vm281_vm1, %v270_v43  ;;  %295 = vst.msk [vmem:[%s658_s3 + $0x68] sm:$0xff] %vm281_vm1, %v278_v44  ;;  %v217_v47 = vadd.f32 %v573_v60, %v216_v45  ;;  %v257_v48 = vadd.f32 %v573_v60, %v256_v46  ;;  %v218_v49 = vpop.f32.mrb[13].mxu0  ;;  %v258_v50 = vpop.f32.mrb[13].mxu1 }
 0x115   :  { %v271_v51 = vmax.f32 %v217_v47, 0.0  ;;  %v279_v52 = vmax.f32 %v257_v48, 0.0 }
 0x116   :  { %v221_v53 = vpop.f32.mrb[14].mxu0  ;;  %v261_v54 = vpop.f32.mrb[14].mxu1 }
 0x117   :  { %288 = vst.msk [vmem:[%s658_s3 + $0x30] sm:$0xff] %vm281_vm1, %v271_v51  ;;  %296 = vst.msk [vmem:[%s658_s3 + $0x70] sm:$0xff] %vm281_vm1, %v279_v52  ;;  %v222_v55 = vadd.f32 %v573_v60, %v221_v53  ;;  %v262_v56 = vadd.f32 %v573_v60, %v261_v54  ;;  %v223_v57 = vpop.f32.mrb[15].mxu0  ;;  %v263_v58 = vpop.f32.mrb[15].mxu1 }
 0x119   :  { %v272_v59 = vmax.f32 %v222_v55, 0.0  ;;  %v280_v61 = vmax.f32 %v262_v56, 0.0 }
 0x11b   :  { %289 = vst.msk [vmem:[%s658_s3 + $0x38] sm:$0xff] %vm281_vm1, %v272_v59  ;;  %297 = vst.msk [vmem:[%s658_s3 + $0x78] sm:$0xff] %vm281_vm1, %v280_v61 }

// kernel: modified_lenet_forward.7
= control target key start
LH: loop header
LB: loop body
LE: loop exit
PB: predicated region body
PF: predicated region fallthrough
CT: control target
= control target key end

     0   :  { %vm105_vm0 = vcmask 261120   ;;  %vm460_vm1 = vcmask 523264   ;;  %s1071_s1 = inlined_call_operand.vmem [shape: f32[288,64], index: 1, kind: input, shape index: {}]   ;;  %s1072_s0 = inlined_call_operand.vmem [shape: f32[128,288], index: 0, kind: input, shape index: {}]   ;;  %s1073_s2 = inlined_call_operand.vmem [shape: f32[1,64], index: 2, kind: input, shape index: {}]   ;;  %s1074_s3 = inlined_call_operand.vmem [shape: f32[128,64], index: 3, kind: output, shape index: {}]  }
   0x1   :  { %v78_v0 = vld [vmem:[%s1071_s1 + $0x80] sm:$0xff]  ;;  %v79_v1 = vld [vmem:[%s1071_s1 + $0x88] sm:$0xff]  ;;  %v80_v5 = vld [vmem:[%s1071_s1 + $0x90] sm:$0xff] }
   0x2   :  { %v62_v2 = vld [vmem:[%s1071_s1] sm:$0xff]  ;;  %v630_v3 = vpack.c.bf16 %v79_v1, %v78_v0  ;;  %v63_v4 = vld [vmem:[%s1071_s1 + $0x8] sm:$0xff]  ;;  %v81_v6 = vld [vmem:[%s1071_s1 + $0x98] sm:$0xff] }
   0x3   :  { %v632_v7 = vpack.c.bf16 %v63_v4, %v62_v2  ;;  %v634_v8 = vpack.c.bf16 %v81_v6, %v80_v5  ;;  %v64_v9 = vld [vmem:[%s1071_s1 + $0x10] sm:$0xff]  ;;  %v65_v10 = vld [vmem:[%s1071_s1 + $0x18] sm:$0xff]  ;;  %v82_v11 = vld [vmem:[%s1071_s1 + $0xa0] sm:$0xff] }
   0x4   :  { %631 = vmatprep.subr.bf16.mxu0 %v630_v3  ;;  %670 = vmatprep.subr.bf16.mxu1 %v630_v3  ;;  %v83_v12 = vld [vmem:[%s1071_s1 + $0xa8] sm:$0xff]  ;;  %v636_v13 = vpack.c.bf16 %v65_v10, %v64_v9  ;;  %v66_v15 = vld [vmem:[%s1071_s1 + $0x20] sm:$0xff]  ;;  %v84_v17 = vld [vmem:[%s1071_s1 + $0xb0] sm:$0xff] }
   0x5   :  { %633 = vmatpush3.bf16.msra.mxu0 %v632_v7  ;;  %678 = vmatpush3.bf16.msra.mxu1 %v632_v7  ;;  %v638_v14 = vpack.c.bf16 %v83_v12, %v82_v11  ;;  %v67_v16 = vld [vmem:[%s1071_s1 + $0x28] sm:$0xff]  ;;  %v85_v18 = vld [vmem:[%s1071_s1 + $0xb8] sm:$0xff]  ;;  %v68_v21 = vld [vmem:[%s1071_s1 + $0x30] sm:$0xff] }
   0x6   :  { %635 = vmatprep.subr.bf16.mxu0 %v634_v8  ;;  %671 = vmatprep.subr.bf16.mxu1 %v634_v8  ;;  %v640_v19 = vpack.c.bf16 %v67_v16, %v66_v15  ;;  %v642_v20 = vpack.c.bf16 %v85_v18, %v84_v17  ;;  %v69_v22 = vld [vmem:[%s1071_s1 + $0x38] sm:$0xff]  ;;  %v86_v23 = vld [vmem:[%s1071_s1 + $0xc0] sm:$0xff]  ;;  %v87_v24 = vld [vmem:[%s1071_s1 + $0xc8] sm:$0xff] }
   0x7   :  { %v15_v25 = vld [vmem:[%s1072_s0 + $0x8] sm:$0xff]  ;;  %v644_v27 = vpack.c.bf16 %v69_v22, %v68_v21  ;;  %v646_v28 = vpack.c.bf16 %v87_v24, %v86_v23  ;;  %v70_v29 = vld [vmem:[%s1071_s1 + $0x40] sm:$0xff]  ;;  %v88_v31 = vld [vmem:[%s1071_s1 + $0xd0] sm:$0xff] }
   0x8   :  { %218 = vmatprep.mubr.f32.mxu0 %v15_v25  ;;  %v51_v26 = vld [vmem:[%s1072_s0 + $0x128] sm:$0xff]  ;;  %v89_v32 = vld [vmem:[%s1071_s1 + $0xd8] sm:$0xff]  ;;  %v72_v35 = vld [vmem:[%s1071_s1 + $0x50] sm:$0xff] }
   0x9   :  { %637 = vmatpush3.bf16.msra.mxu0 %v636_v13  ;;  %679 = vmatpush3.bf16.msra.mxu1 %v636_v13  ;;  %v71_v30 = vld [vmem:[%s1071_s1 + $0x48] sm:$0xff]  ;;  %v650_v34 = vpack.c.bf16 %v89_v32, %v88_v31  ;;  %v73_v36 = vld [vmem:[%s1071_s1 + $0x58] sm:$0xff]  ;;  %v90_v37 = vld [vmem:[%s1071_s1 + $0xe0] sm:$0xff] }
   0xa   :  { %639 = vmatprep.subr.bf16.mxu0 %v638_v14  ;;  %672 = vmatprep.subr.bf16.mxu1 %v638_v14  ;;  %v648_v33 = vpack.c.bf16 %v71_v30, %v70_v29  ;;  %v91_v38 = vld [vmem:[%s1071_s1 + $0xe8] sm:$0xff]  ;;  %v652_v39 = vpack.c.bf16 %v73_v36, %v72_v35  ;;  %v74_v41 = vld [vmem:[%s1071_s1 + $0x60] sm:$0xff]  ;;  %v92_v43 = vld [vmem:[%s1071_s1 + $0xf0] sm:$0xff] }
   0xb   :  { %278 = vmatprep.mubr.f32.mxu1 %v51_v26  ;;  %v654_v40 = vpack.c.bf16 %v91_v38, %v90_v37  ;;  %v75_v42 = vld [vmem:[%s1071_s1 + $0x68] sm:$0xff]  ;;  %v93_v44 = vld [vmem:[%s1071_s1 + $0xf8] sm:$0xff]  ;;  %v76_v47 = vld [vmem:[%s1071_s1 + $0x70] sm:$0xff] }
   0xc   :  { %v656_v45 = vpack.c.bf16 %v75_v42, %v74_v41  ;;  %v658_v46 = vpack.c.bf16 %v93_v44, %v92_v43  ;;  %v77_v48 = vld [vmem:[%s1071_s1 + $0x78] sm:$0xff]  ;;  %v94_v49 = vld [vmem:[%s1071_s1 + $0x100] sm:$0xff]  ;;  %v95_v50 = vld [vmem:[%s1071_s1 + $0x108] sm:$0xff] }
   0xd   :  { %641 = vmatpush3.bf16.msra.mxu0 %v640_v19  ;;  %680 = vmatpush3.bf16.msra.mxu1 %v640_v19  ;;  %v660_v51 = vpack.c.bf16 %v77_v48, %v76_v47  ;;  %v662_v52 = vpack.c.bf16 %v95_v50, %v94_v49  ;;  %v96_v53 = vld [vmem:[%s1071_s1 + $0x110] sm:$0xff]  ;;  %v97_v54 = vld [vmem:[%s1071_s1 + $0x118] sm:$0xff]  ;;  %v14_v55 = vld [vmem:[%s1072_s0] sm:$0xff] }
   0xe   :  { %643 = vmatprep.subr.bf16.mxu0 %v642_v20  ;;  %673 = vmatprep.subr.bf16.mxu1 %v642_v20  ;;  %v50_v56 = vld [vmem:[%s1072_s0 + $0x120] sm:$0xff]  ;;  %v666_v59 = vpack.c.bf16 %v97_v54, %v96_v53  ;;  %v17_v60 = vld [vmem:[%s1072_s0 + $0x18] sm:$0xff]  ;;  %v20_v0 = vld [vmem:[%s1072_s0 + $0x30] sm:$0xff] }
   0xf   :  { %v18_v57 = vld [vmem:[%s1072_s0 + $0x20] sm:$0xff]  ;;  %v53_v61 = vld [vmem:[%s1072_s0 + $0x138] sm:$0xff]  ;;  %v56_v1 = vld [vmem:[%s1072_s0 + $0x150] sm:$0xff] }
  0x10   :  { %v54_v58 = vld [vmem:[%s1072_s0 + $0x140] sm:$0xff]  ;;  %v21_v62 = vld [vmem:[%s1072_s0 + $0x38] sm:$0xff]  ;;  %v24_v2 = vld [vmem:[%s1072_s0 + $0x50] sm:$0xff] }
  0x11   :  { %645 = vmatpush3.bf16.msra.mxu0 %v644_v27  ;;  %681 = vmatpush3.bf16.msra.mxu1 %v644_v27  ;;  %v57_v63 = vld [vmem:[%s1072_s0 + $0x158] sm:$0xff]  ;;  %v60_v3 = vld [vmem:[%s1072_s0 + $0x170] sm:$0xff]  ;;  %v23_v4 = vld [vmem:[%s1072_s0 + $0x48] sm:$0xff] }
  0x12   :  { %647 = vmatprep.subr.bf16.mxu0 %v646_v28  ;;  %674 = vmatprep.subr.bf16.mxu1 %v646_v28  ;;  %v59_v5 = vld [vmem:[%s1072_s0 + $0x168] sm:$0xff]  ;;  %v16_v7 = vld [vmem:[%s1072_s0 + $0x10] sm:$0xff]  ;;  %v26_v8 = vld [vmem:[%s1072_s0 + $0x60] sm:$0xff] }
  0x13   :  { %v27_v6 = vld [vmem:[%s1072_s0 + $0x68] sm:$0xff]  ;;  %v30_v10 = vld [vmem:[%s1072_s0 + $0x80] sm:$0xff]  ;;  %v29_v12 = vld [vmem:[%s1072_s0 + $0x78] sm:$0xff] }
  0x14   :  { %v19_v9 = vld [vmem:[%s1072_s0 + $0x28] sm:$0xff]  ;;  %v22_v11 = vld [vmem:[%s1072_s0 + $0x40] sm:$0xff]  ;;  %v25_v13 = vld [vmem:[%s1072_s0 + $0x58] sm:$0xff] }
  0x15   :  { %649 = vmatpush3.bf16.msra.mxu0 %v648_v33  ;;  %682 = vmatpush3.bf16.msra.mxu1 %v648_v33  ;;  %v33_v14 = vld [vmem:[%s1072_s0 + $0x98] sm:$0xff]  ;;  %v28_v15 = vld [vmem:[%s1072_s0 + $0x70] sm:$0xff]  ;;  %v31_v17 = vld [vmem:[%s1072_s0 + $0x88] sm:$0xff] }
  0x16   :  { %651 = vmatprep.subr.bf16.mxu0 %v650_v34  ;;  %675 = vmatprep.subr.bf16.mxu1 %v650_v34  ;;  %v32_v16 = vld [vmem:[%s1072_s0 + $0x90] sm:$0xff]  ;;  %v34_v19 = vld [vmem:[%s1072_s0 + $0xa0] sm:$0xff]  ;;  %v35_v20 = vld [vmem:[%s1072_s0 + $0xa8] sm:$0xff] }
  0x17   :  { %v36_v18 = vld [vmem:[%s1072_s0 + $0xb0] sm:$0xff]  ;;  %v37_v21 = vld [vmem:[%s1072_s0 + $0xb8] sm:$0xff]  ;;  %v39_v22 = vld [vmem:[%s1072_s0 + $0xc8] sm:$0xff] }
  0x18   :  { %v40_v23 = vld [vmem:[%s1072_s0 + $0xd0] sm:$0xff]  ;;  %v38_v24 = vld [vmem:[%s1072_s0 + $0xc0] sm:$0xff]  ;;  %v43_v25 = vld [vmem:[%s1072_s0 + $0xe8] sm:$0xff] }
  0x19   :  { %653 = vmatpush3.bf16.msra.mxu0 %v652_v39  ;;  %683 = vmatpush3.bf16.msra.mxu1 %v652_v39  ;;  %v42_v26 = vld [vmem:[%s1072_s0 + $0xe0] sm:$0xff]  ;;  %v41_v28 = vld [vmem:[%s1072_s0 + $0xd8] sm:$0xff]  ;;  %v52_v31 = vld [vmem:[%s1072_s0 + $0x130] sm:$0xff] }
  0x1a   :  { %655 = vmatprep.subr.bf16.mxu0 %v654_v40  ;;  %676 = vmatprep.subr.bf16.mxu1 %v654_v40  ;;  %v46_v27 = vld [vmem:[%s1072_s0 + $0x100] sm:$0xff]  ;;  %v49_v29 = vld [vmem:[%s1072_s0 + $0x118] sm:$0xff]  ;;  %v44_v32 = vld [vmem:[%s1072_s0 + $0xf0] sm:$0xff] }
  0x1b   :  { %v45_v30 = vld [vmem:[%s1072_s0 + $0xf8] sm:$0xff]  ;;  %v55_v33 = vld [vmem:[%s1072_s0 + $0x148] sm:$0xff]  ;;  %v48_v34 = vld [vmem:[%s1072_s0 + $0x110] sm:$0xff] }
  0x1c   :  { %v58_v35 = vld [vmem:[%s1072_s0 + $0x160] sm:$0xff]  ;;  %v47_v36 = vld [vmem:[%s1072_s0 + $0x108] sm:$0xff]  ;;  %v61_v37 = vld [vmem:[%s1072_s0 + $0x178] sm:$0xff] }
  0x1d   :  { %657 = vmatpush3.bf16.msra.mxu0 %v656_v45  ;;  %684 = vmatpush3.bf16.msra.mxu1 %v656_v45 }
  0x1e   :  { %659 = vmatprep.subr.bf16.mxu0 %v658_v46  ;;  %677 = vmatprep.subr.bf16.mxu1 %v658_v46 }
  0x21   :  { %661 = vmatpush3.bf16.msra.mxu0 %v660_v51  ;;  %685 = vmatpush3.bf16.msra.mxu1 %v660_v51 }
  0x22   :  { %663 = vmatprep.subr.bf16.mxu1 %v662_v52 }
  0x24   :  { %219 = vmatmul.mubr.f32.vlgmr.msra.gmra.mrb[0].mxu0 %v14_v55  ;;  %279 = vmatmul.mubr.f32.vlgmr.msra.gmra.mrb[0].mxu1 %v50_v56 }
  0x25   :  { %223 = vmatprep.mubr.f32.mxu0 %v18_v57  ;;  %283 = vmatprep.mubr.f32.mxu1 %v54_v58 }
  0x26   :  { %665 = vmatpush3.bf16.msra.mxu1 %v662_v52 }
  0x27   :  { %667 = vmatprep.subr.bf16.mxu1 %v666_v59 }
  0x28   :  { %224 = vmatmul.mubr.f32.gmra.mrb[2].mxu0 %v17_v60  ;;  %284 = vmatmul.mubr.f32.gmra.mrb[2].mxu1 %v53_v61  ;;  %v983_v60 = vld [vmem:[%s1073_s2] ss:$0 sm:$0xff] }
  0x29   :  { %228 = vmatprep.mubr.f32.mxu0 %v21_v62  ;;  %288 = vmatprep.mubr.f32.mxu1 %v57_v63 }
  0x2a   :  { %669 = vmatpush3.bf16.msra.mxu1 %v666_v59 }
  0x2c   :  { %229 = vmatmul.mubr.f32.gmra.mrb[4].mxu0 %v20_v0  ;;  %289 = vmatmul.mubr.f32.gmra.mrb[4].mxu1 %v56_v1 }
  0x2d   :  { %233 = vmatprep.mubr.f32.mxu0 %v24_v2  ;;  %293 = vmatprep.mubr.f32.mxu1 %v60_v3 }
  0x30   :  { %234 = vmatmul.mubr.f32.gmra.mrb[6].mxu0 %v23_v4  ;;  %294 = vmatmul.mubr.f32.gmra.mrb[6].mxu1 %v59_v5 }
  0x31   :  { %238 = vmatprep.mubr.f32.mxu0 %v27_v6  ;;  %606 = vmatprep.mubr.msk.f32.mxu1 %vm105_vm0, %v16_v7 }
  0x34   :  { %239 = vmatmul.mubr.f32.gmra.mrb[8].mxu0 %v26_v8  ;;  %607 = vmatmul.mubr.msk.f32.vlgmr.msra.gmra.mrb[8].mxu1 %vm105_vm0, %v19_v9 }
  0x35   :  { %243 = vmatprep.mubr.f32.mxu0 %v30_v10  ;;  %609 = vmatprep.mubr.msk.f32.mxu1 %vm105_vm0, %v22_v11 }
  0x38   :  { %244 = vmatmul.mubr.f32.gmra.mrb[10].mxu0 %v29_v12  ;;  %610 = vmatmul.mubr.msk.f32.gmra.mrb[10].mxu1 %vm105_vm0, %v25_v13 }
  0x39   :  { %248 = vmatprep.mubr.f32.mxu0 %v33_v14  ;;  %612 = vmatprep.mubr.msk.f32.mxu1 %vm105_vm0, %v28_v15 }
  0x3c   :  { %249 = vmatmul.mubr.f32.gmra.mrb[12].mxu0 %v32_v16  ;;  %613 = vmatmul.mubr.msk.f32.gmra.mrb[12].mxu1 %vm105_vm0, %v31_v17 }
  0x3d   :  { %253 = vmatprep.mubr.f32.mxu0 %v36_v18  ;;  %615 = vmatprep.mubr.msk.f32.mxu1 %vm105_vm0, %v34_v19 }
  0x40   :  { %254 = vmatmul.mubr.f32.gmra.mrb[14].mxu0 %v35_v20  ;;  %616 = vmatmul.mubr.msk.f32.gmra.mrb[14].mxu1 %vm105_vm0, %v37_v21 }
  0x41   :  { %258 = vmatprep.mubr.f32.mxu0 %v39_v22  ;;  %618 = vmatprep.mubr.msk.f32.mxu1 %vm105_vm0, %v40_v23 }
  0x44   :  { %259 = vmatmul.mubr.f32.gmra.mrb[16].mxu0 %v38_v24  ;;  %619 = vmatmul.mubr.msk.f32.gmra.mrb[16].mxu1 %vm105_vm0, %v43_v25 }
  0x45   :  { %263 = vmatprep.mubr.f32.mxu0 %v42_v26  ;;  %621 = vmatprep.mubr.msk.f32.mxu1 %vm105_vm0, %v46_v27 }
  0x48   :  { %264 = vmatmul.mubr.f32.gmra.mrb[18].mxu0 %v41_v28  ;;  %622 = vmatmul.mubr.msk.f32.gmra.mrb[18].mxu1 %vm105_vm0, %v49_v29 }
  0x49   :  { %268 = vmatprep.mubr.f32.mxu0 %v45_v30  ;;  %624 = vmatprep.mubr.msk.f32.mxu1 %vm105_vm0, %v52_v31 }
  0x4c   :  { %269 = vmatmul.mubr.f32.gmra.mrb[20].mxu0 %v44_v32  ;;  %625 = vmatmul.mubr.msk.f32.gmra.mrb[20].mxu1 %vm105_vm0, %v55_v33 }
  0x4d   :  { %273 = vmatprep.mubr.f32.mxu0 %v48_v34  ;;  %627 = vmatprep.mubr.msk.f32.mxu1 %vm105_vm0, %v58_v35 }
  0x50   :  { %274 = vmatmul.mubr.f32.gmra.mrb[22].mxu0 %v47_v36  ;;  %628 = vmatmul.mubr.msk.f32.gmra.mrb[22].mxu1 %vm105_vm0, %v61_v37 }
  0xf7   :  { %v530_v38 = vpop.f32.mrb[0].mxu0  ;;  %v566_v39 = vpop.f32.mrb[0].mxu1 }
  0xf8   :  { %v531_v40 = vpop.f32.mrb[1].mxu0  ;;  %v567_v41 = vpop.f32.mrb[1].mxu1 }
  0xf9   :  { %v532_v42 = vadd.f32 %v531_v40, %v530_v38  ;;  %v974_v43 = vadd.f32 %v567_v41, %v566_v39 }
  0xfb   :  { %v533_v44 = vpop.f32.mrb[2].mxu0  ;;  %v569_v45 = vpop.f32.mrb[2].mxu1  ;;  %v221_v2 = vadd.f32 %v532_v42, %v983_v60 }
  0xfc   :  { %v534_v46 = vpop.f32.mrb[3].mxu0  ;;  %v570_v47 = vpop.f32.mrb[3].mxu1 }
  0xfd   :  { %v535_v48 = vadd.f32 %v534_v46, %v533_v44  ;;  %v976_v49 = vadd.f32 %v570_v47, %v569_v45 }
  0xff   :  { %v536_v50 = vpop.f32.mrb[4].mxu0  ;;  %v572_v51 = vpop.f32.mrb[4].mxu1  ;;  %v226_v63 = vadd.f32 %v535_v48, %v983_v60 }
 0x100   :  { %v537_v52 = vpop.f32.mrb[5].mxu0  ;;  %v573_v53 = vpop.f32.mrb[5].mxu1 }
 0x101   :  { %v538_v54 = vadd.f32 %v537_v52, %v536_v50  ;;  %v978_v55 = vadd.f32 %v573_v53, %v572_v51 }
 0x103   :  { %v539_v56 = vpop.f32.mrb[6].mxu0  ;;  %v575_v57 = vpop.f32.mrb[6].mxu1  ;;  %v231_v13 = vadd.f32 %v538_v54, %v983_v60 }
 0x104   :  { %v540_v58 = vpop.f32.mrb[7].mxu0  ;;  %v576_v59 = vpop.f32.mrb[7].mxu1 }
 0x105   :  { %v541_v61 = vadd.f32 %v540_v58, %v539_v56  ;;  %v985_v62 = vadd.f32 %v576_v59, %v575_v57  ;;  %v286_v58 = vadd.f32 %v976_v49, %v983_v60 }
 0x107   :  { %v542_v0 = vpop.f32.mrb[8].mxu0  ;;  %v608_v1 = vpop.f32.mrb[8].mxu1  ;;  %v236_v9 = vadd.f32 %v541_v61, %v983_v60 }
 0x108   :  { %v371_v3 = vadd.f32 %v608_v1, %v226_v63  ;;  %v543_v4 = vpop.f32.mrb[9].mxu0  ;;  %v365_v5 = vpop.f32.mrb[9].mxu1  ;;  %v281_v1 = vadd.f32 %v974_v43, %v983_v60 }
 0x109   :  { %v544_v6 = vadd.f32 %v543_v4, %v542_v0  ;;  %v366_v7 = vadd.f32 %v365_v5, %v221_v2 }
 0x10a   :  { %v445_v8 = vmax.f32 %v371_v3, 0.0 }
 0x10b   :  { %v444_v10 = vmax.f32 %v366_v7, 0.0  ;;  %v545_v11 = vpop.f32.mrb[10].mxu0  ;;  %v611_v12 = vpop.f32.mrb[10].mxu1  ;;  %v241_v24 = vadd.f32 %v544_v6, %v983_v60 }
 0x10c   :  { %462 = vst.msk [vmem:[%s1074_s3 + $0x8] sm:$0xff] %vm460_vm1, %v445_v8  ;;  %v381_v14 = vadd.f32 %v611_v12, %v236_v9  ;;  %v546_v15 = vpop.f32.mrb[11].mxu0  ;;  %v375_v16 = vpop.f32.mrb[11].mxu1  ;;  %v296_v8 = vadd.f32 %v985_v62, %v983_v60 }
 0x10d   :  { %461 = vst.msk [vmem:[%s1074_s3] sm:$0xff] %vm460_vm1, %v444_v10  ;;  %v547_v17 = vadd.f32 %v546_v15, %v545_v11  ;;  %v376_v18 = vadd.f32 %v375_v16, %v231_v13  ;;  %v291_v13 = vadd.f32 %v978_v55, %v983_v60 }
 0x10e   :  { %v447_v19 = vmax.f32 %v381_v14, 0.0 }
 0x10f   :  { %v446_v20 = vmax.f32 %v376_v18, 0.0  ;;  %v548_v21 = vpop.f32.mrb[12].mxu0  ;;  %v246_v22 = vadd.f32 %v547_v17, %v983_v60  ;;  %v614_v23 = vpop.f32.mrb[12].mxu1 }
 0x110   :  { %464 = vst.msk [vmem:[%s1074_s3 + $0x18] sm:$0xff] %vm460_vm1, %v447_v19  ;;  %v549_v25 = vpop.f32.mrb[13].mxu0  ;;  %v385_v26 = vpop.f32.mrb[13].mxu1 }
 0x111   :  { %463 = vst.msk [vmem:[%s1074_s3 + $0x10] sm:$0xff] %vm460_vm1, %v446_v20  ;;  %v391_v27 = vadd.f32 %v614_v23, %v246_v22  ;;  %v550_v28 = vadd.f32 %v549_v25, %v548_v21  ;;  %v386_v29 = vadd.f32 %v385_v26, %v241_v24 }
 0x113   :  { %v449_v30 = vmax.f32 %v391_v27, 0.0  ;;  %v448_v31 = vmax.f32 %v386_v29, 0.0  ;;  %v551_v32 = vpop.f32.mrb[14].mxu0  ;;  %v617_v33 = vpop.f32.mrb[14].mxu1  ;;  %v251_v34 = vadd.f32 %v550_v28, %v983_v60 }
 0x114   :  { %v552_v35 = vpop.f32.mrb[15].mxu0  ;;  %v395_v36 = vpop.f32.mrb[15].mxu1 }
 0x115   :  { %466 = vst.msk [vmem:[%s1074_s3 + $0x28] sm:$0xff] %vm460_vm1, %v449_v30  ;;  %465 = vst.msk [vmem:[%s1074_s3 + $0x20] sm:$0xff] %vm460_vm1, %v448_v31  ;;  %v553_v37 = vadd.f32 %v552_v35, %v551_v32  ;;  %v396_v38 = vadd.f32 %v395_v36, %v251_v34 }
 0x117   :  { %v256_v39 = vadd.f32 %v553_v37, %v983_v60  ;;  %v450_v40 = vmax.f32 %v396_v38, 0.0  ;;  %v554_v41 = vpop.f32.mrb[16].mxu0  ;;  %v620_v42 = vpop.f32.mrb[16].mxu1 }
 0x118   :  { %v555_v44 = vpop.f32.mrb[17].mxu0  ;;  %v405_v45 = vpop.f32.mrb[17].mxu1 }
 0x119   :  { %v401_v46 = vadd.f32 %v617_v33, %v256_v39  ;;  %467 = vst.msk [vmem:[%s1074_s3 + $0x30] sm:$0xff] %vm460_vm1, %v450_v40  ;;  %v556_v47 = vadd.f32 %v555_v44, %v554_v41 }
 0x11b   :  { %v451_v48 = vmax.f32 %v401_v46, 0.0  ;;  %v557_v50 = vpop.f32.mrb[18].mxu0  ;;  %v261_v51 = vadd.f32 %v556_v47, %v983_v60  ;;  %v623_v52 = vpop.f32.mrb[18].mxu1 }
 0x11c   :  { %v558_v53 = vpop.f32.mrb[19].mxu0  ;;  %v415_v54 = vpop.f32.mrb[19].mxu1 }
 0x11d   :  { %468 = vst.msk [vmem:[%s1074_s3 + $0x38] sm:$0xff] %vm460_vm1, %v451_v48  ;;  %v406_v56 = vadd.f32 %v405_v45, %v261_v51  ;;  %v559_v57 = vadd.f32 %v558_v53, %v557_v50 }
 0x11f   :  { %v452_v59 = vmax.f32 %v406_v56, 0.0  ;;  %v266_v61 = vadd.f32 %v559_v57, %v983_v60  ;;  %v560_v63 = vpop.f32.mrb[20].mxu0  ;;  %v626_v0 = vpop.f32.mrb[20].mxu1 }
 0x120   :  { %v431_v2 = vadd.f32 %v626_v0, %v286_v58  ;;  %v561_v3 = vpop.f32.mrb[21].mxu0  ;;  %v425_v4 = vpop.f32.mrb[21].mxu1 }
 0x121   :  { %469 = vst.msk [vmem:[%s1074_s3 + $0x40] sm:$0xff] %vm460_vm1, %v452_v59  ;;  %v411_v5 = vadd.f32 %v620_v42, %v266_v61  ;;  %v562_v6 = vadd.f32 %v561_v3, %v560_v63  ;;  %v426_v7 = vadd.f32 %v425_v4, %v281_v1 }
 0x122   :  { %v457_v49 = vmax.f32 %v431_v2, 0.0 }
 0x123   :  { %v453_v9 = vmax.f32 %v411_v5, 0.0  ;;  %v271_v10 = vadd.f32 %v562_v6, %v983_v60  ;;  %v456_v11 = vmax.f32 %v426_v7, 0.0  ;;  %v563_v43 = vpop.f32.mrb[22].mxu0  ;;  %v629_v12 = vpop.f32.mrb[22].mxu1 }
 0x124   :  { %474 = vst.msk [vmem:[%s1074_s3 + $0x68] sm:$0xff] %vm460_vm1, %v457_v49  ;;  %v441_v14 = vadd.f32 %v629_v12, %v296_v8  ;;  %v564_v15 = vpop.f32.mrb[23].mxu0  ;;  %v435_v16 = vpop.f32.mrb[23].mxu1 }
 0x125   :  { %470 = vst.msk [vmem:[%s1074_s3 + $0x48] sm:$0xff] %vm460_vm1, %v453_v9  ;;  %v416_v62 = vadd.f32 %v415_v54, %v271_v10  ;;  %473 = vst.msk [vmem:[%s1074_s3 + $0x60] sm:$0xff] %vm460_vm1, %v456_v11  ;;  %v565_v55 = vadd.f32 %v564_v15, %v563_v43  ;;  %v436_v17 = vadd.f32 %v435_v16, %v291_v13 }
 0x126   :  { %v459_v18 = vmax.f32 %v441_v14, 0.0 }
 0x127   :  { %v454_v19 = vmax.f32 %v416_v62, 0.0  ;;  %v276_v20 = vadd.f32 %v565_v55, %v983_v60  ;;  %v458_v21 = vmax.f32 %v436_v17, 0.0 }
 0x128   :  { %476 = vst.msk [vmem:[%s1074_s3 + $0x78] sm:$0xff] %vm460_vm1, %v459_v18 }
 0x129   :  { %471 = vst.msk [vmem:[%s1074_s3 + $0x50] sm:$0xff] %vm460_vm1, %v454_v19  ;;  %v421_v22 = vadd.f32 %v623_v52, %v276_v20  ;;  %475 = vst.msk [vmem:[%s1074_s3 + $0x70] sm:$0xff] %vm460_vm1, %v458_v21 }
 0x12b   :  { %v455_v23 = vmax.f32 %v421_v22, 0.0 }
 0x12d   :  { %472 = vst.msk [vmem:[%s1074_s3 + $0x58] sm:$0xff] %vm460_vm1, %v455_v23 }

// kernel: modified_lenet_forward.8
= control target key start
LH: loop header
LB: loop body
LE: loop exit
PB: predicated region body
PF: predicated region fallthrough
CT: control target
= control target key end

     0   :  { %vm113_vm0 = vcmask 523264   ;;  %s919_s1 = inlined_call_operand.vmem [shape: f32[576,128], index: 1, kind: input, shape index: {}]   ;;  %s920_s0 = inlined_call_operand.vmem [shape: f32[32,576], index: 0, kind: input, shape index: {}]   ;;  %s921_s2 = inlined_call_operand.vmem [shape: f32[1,128], index: 2, kind: input, shape index: {}]   ;;  %s922_s3 = inlined_call_operand.vmem [shape: f32[32,128], index: 3, kind: output, shape index: {}]  }
   0x1   :  { %v50_v0 = vld [vmem:[%s919_s1 + $0x80] sm:$0xff]  ;;  %v51_v1 = vld [vmem:[%s919_s1 + $0x88] sm:$0xff]  ;;  %v52_v11 = vld [vmem:[%s919_s1 + $0x90] sm:$0xff] }
   0x2   :  { %v82_v2 = vld [vmem:[%s919_s1 + $0x180] sm:$0xff]  ;;  %v520_v3 = vpack.c.bf16 %v51_v1, %v50_v0  ;;  %v83_v4 = vld [vmem:[%s919_s1 + $0x188] sm:$0xff]  ;;  %v53_v13 = vld [vmem:[%s919_s1 + $0x98] sm:$0xff] }
   0x3   :  { %v34_v5 = vld [vmem:[%s919_s1] sm:$0xff]  ;;  %v35_v6 = vld [vmem:[%s919_s1 + $0x8] sm:$0xff]  ;;  %v552_v7 = vpack.c.bf16 %v83_v4, %v82_v2  ;;  %v84_v14 = vld [vmem:[%s919_s1 + $0x190] sm:$0xff]  ;;  %v524_v16 = vpack.c.bf16 %v53_v13, %v52_v11 }
   0x4   :  { %v522_v8 = vpack.c.bf16 %v35_v6, %v34_v5  ;;  %v66_v9 = vld [vmem:[%s919_s1 + $0x100] sm:$0xff]  ;;  %v67_v10 = vld [vmem:[%s919_s1 + $0x108] sm:$0xff]  ;;  %521 = vmatprep.subr.bf16.mxu0 %v520_v3  ;;  %v85_v15 = vld [vmem:[%s919_s1 + $0x198] sm:$0xff] }
   0x5   :  { %v554_v12 = vpack.c.bf16 %v67_v10, %v66_v9  ;;  %553 = vmatprep.subr.bf16.mxu1 %v552_v7  ;;  %v556_v17 = vpack.c.bf16 %v85_v15, %v84_v14  ;;  %v36_v18 = vld [vmem:[%s919_s1 + $0x10] sm:$0xff]  ;;  %v37_v19 = vld [vmem:[%s919_s1 + $0x18] sm:$0xff]  ;;  %v54_v23 = vld [vmem:[%s919_s1 + $0xa0] sm:$0xff] }
   0x6   :  { %523 = vmatpush3.bf16.msra.mxu0 %v522_v8  ;;  %v68_v20 = vld [vmem:[%s919_s1 + $0x110] sm:$0xff]  ;;  %v526_v21 = vpack.c.bf16 %v37_v19, %v36_v18  ;;  %v69_v22 = vld [vmem:[%s919_s1 + $0x118] sm:$0xff]  ;;  %v55_v24 = vld [vmem:[%s919_s1 + $0xa8] sm:$0xff] }
   0x7   :  { %555 = vmatpush3.bf16.msra.mxu1 %v554_v12  ;;  %525 = vmatprep.subr.bf16.mxu0 %v524_v16  ;;  %v558_v25 = vpack.c.bf16 %v69_v22, %v68_v20  ;;  %v528_v26 = vpack.c.bf16 %v55_v24, %v54_v23  ;;  %v86_v27 = vld [vmem:[%s919_s1 + $0x1a0] sm:$0xff]  ;;  %v87_v28 = vld [vmem:[%s919_s1 + $0x1a8] sm:$0xff]  ;;  %v56_v35 = vld [vmem:[%s919_s1 + $0xb0] sm:$0xff] }
   0x8   :  { %557 = vmatprep.subr.bf16.mxu1 %v556_v17  ;;  %v38_v29 = vld [vmem:[%s919_s1 + $0x20] sm:$0xff]  ;;  %v560_v30 = vpack.c.bf16 %v87_v28, %v86_v27  ;;  %v39_v31 = vld [vmem:[%s919_s1 + $0x28] sm:$0xff]  ;;  %v57_v36 = vld [vmem:[%s919_s1 + $0xb8] sm:$0xff] }
   0x9   :  { %v70_v32 = vld [vmem:[%s919_s1 + $0x120] sm:$0xff]  ;;  %v71_v33 = vld [vmem:[%s919_s1 + $0x128] sm:$0xff]  ;;  %v530_v34 = vpack.c.bf16 %v39_v31, %v38_v29  ;;  %v88_v37 = vld [vmem:[%s919_s1 + $0x1b0] sm:$0xff]  ;;  %v532_v39 = vpack.c.bf16 %v57_v36, %v56_v35 }
   0xa   :  { %527 = vmatpush3.bf16.msra.mxu0 %v526_v21  ;;  %v562_v38 = vpack.c.bf16 %v71_v33, %v70_v32  ;;  %v89_v40 = vld [vmem:[%s919_s1 + $0x1b8] sm:$0xff]  ;;  %v40_v41 = vld [vmem:[%s919_s1 + $0x30] sm:$0xff]  ;;  %v58_v46 = vld [vmem:[%s919_s1 + $0xc0] sm:$0xff] }
   0xb   :  { %559 = vmatpush3.bf16.msra.mxu1 %v558_v25  ;;  %529 = vmatprep.subr.bf16.mxu0 %v528_v26  ;;  %v41_v42 = vld [vmem:[%s919_s1 + $0x38] sm:$0xff]  ;;  %v564_v43 = vpack.c.bf16 %v89_v40, %v88_v37  ;;  %v72_v44 = vld [vmem:[%s919_s1 + $0x130] sm:$0xff]  ;;  %v59_v47 = vld [vmem:[%s919_s1 + $0xc8] sm:$0xff] }
   0xc   :  { %561 = vmatprep.subr.bf16.mxu1 %v560_v30  ;;  %v73_v45 = vld [vmem:[%s919_s1 + $0x138] sm:$0xff]  ;;  %v90_v48 = vld [vmem:[%s919_s1 + $0x1c0] sm:$0xff]  ;;  %v91_v49 = vld [vmem:[%s919_s1 + $0x1c8] sm:$0xff]  ;;  %v534_v50 = vpack.c.bf16 %v41_v42, %v40_v41  ;;  %v536_v52 = vpack.c.bf16 %v59_v47, %v58_v46 }
   0xd   :  { %v566_v51 = vpack.c.bf16 %v73_v45, %v72_v44  ;;  %v42_v53 = vld [vmem:[%s919_s1 + $0x40] sm:$0xff]  ;;  %v43_v54 = vld [vmem:[%s919_s1 + $0x48] sm:$0xff]  ;;  %v568_v56 = vpack.c.bf16 %v91_v49, %v90_v48  ;;  %v60_v58 = vld [vmem:[%s919_s1 + $0xd0] sm:$0xff] }
   0xe   :  { %531 = vmatpush3.bf16.msra.mxu0 %v530_v34  ;;  %v74_v55 = vld [vmem:[%s919_s1 + $0x140] sm:$0xff]  ;;  %v75_v57 = vld [vmem:[%s919_s1 + $0x148] sm:$0xff]  ;;  %v61_v59 = vld [vmem:[%s919_s1 + $0xd8] sm:$0xff]  ;;  %v538_v62 = vpack.c.bf16 %v43_v54, %v42_v53 }
   0xf   :  { %563 = vmatpush3.bf16.msra.mxu1 %v562_v38  ;;  %533 = vmatprep.subr.bf16.mxu0 %v532_v39  ;;  %v92_v60 = vld [vmem:[%s919_s1 + $0x1d0] sm:$0xff]  ;;  %v93_v61 = vld [vmem:[%s919_s1 + $0x1d8] sm:$0xff]  ;;  %v570_v63 = vpack.c.bf16 %v75_v57, %v74_v55  ;;  %v540_v0 = vpack.c.bf16 %v61_v59, %v60_v58  ;;  %v62_v6 = vld [vmem:[%s919_s1 + $0xe0] sm:$0xff] }
  0x10   :  { %565 = vmatprep.subr.bf16.mxu1 %v564_v43  ;;  %v44_v1 = vld [vmem:[%s919_s1 + $0x50] sm:$0xff]  ;;  %v45_v2 = vld [vmem:[%s919_s1 + $0x58] sm:$0xff]  ;;  %v572_v4 = vpack.c.bf16 %v93_v61, %v92_v60  ;;  %v63_v7 = vld [vmem:[%s919_s1 + $0xe8] sm:$0xff] }
  0x11   :  { %v76_v3 = vld [vmem:[%s919_s1 + $0x150] sm:$0xff]  ;;  %v77_v5 = vld [vmem:[%s919_s1 + $0x158] sm:$0xff]  ;;  %v94_v8 = vld [vmem:[%s919_s1 + $0x1e0] sm:$0xff]  ;;  %v542_v10 = vpack.c.bf16 %v45_v2, %v44_v1  ;;  %v544_v14 = vpack.c.bf16 %v63_v7, %v62_v6 }
  0x12   :  { %535 = vmatpush3.bf16.msra.mxu0 %v534_v50  ;;  %v95_v9 = vld [vmem:[%s919_s1 + $0x1e8] sm:$0xff]  ;;  %v46_v11 = vld [vmem:[%s919_s1 + $0x60] sm:$0xff]  ;;  %v574_v13 = vpack.c.bf16 %v77_v5, %v76_v3  ;;  %v17_v17 = vld [vmem:[%s920_s0 + $0x18] sm:$0xff] }
  0x13   :  { %567 = vmatpush3.bf16.msra.mxu1 %v566_v51  ;;  %537 = vmatprep.subr.bf16.mxu0 %v536_v52  ;;  %v47_v12 = vld [vmem:[%s919_s1 + $0x68] sm:$0xff]  ;;  %v78_v15 = vld [vmem:[%s919_s1 + $0x160] sm:$0xff]  ;;  %v576_v18 = vpack.c.bf16 %v95_v9, %v94_v8  ;;  %v64_v20 = vld [vmem:[%s919_s1 + $0xf0] sm:$0xff] }
  0x14   :  { %569 = vmatprep.subr.bf16.mxu1 %v568_v56  ;;  %v15_v16 = vld [vmem:[%s920_s0 + $0x8] sm:$0xff]  ;;  %v65_v21 = vld [vmem:[%s919_s1 + $0xf8] sm:$0xff]  ;;  %v96_v22 = vld [vmem:[%s919_s1 + $0x1f0] sm:$0xff]  ;;  %275 = vmatprep.mubr.f32.mxu1 %v17_v17  ;;  %v546_v24 = vpack.c.bf16 %v47_v12, %v46_v11 }
  0x15   :  { %v79_v19 = vld [vmem:[%s919_s1 + $0x168] sm:$0xff]  ;;  %190 = vmatprep.mubr.f32.mxu0 %v15_v16  ;;  %v97_v23 = vld [vmem:[%s919_s1 + $0x1f8] sm:$0xff]  ;;  %v548_v26 = vpack.c.bf16 %v65_v21, %v64_v20  ;;  %v48_v27 = vld [vmem:[%s919_s1 + $0x70] sm:$0xff] }
  0x16   :  { %539 = vmatpush3.bf16.msra.mxu0 %v538_v62  ;;  %v578_v25 = vpack.c.bf16 %v79_v19, %v78_v15  ;;  %v49_v28 = vld [vmem:[%s919_s1 + $0x78] sm:$0xff]  ;;  %v80_v29 = vld [vmem:[%s919_s1 + $0x170] sm:$0xff]  ;;  %v580_v30 = vpack.c.bf16 %v97_v23, %v96_v22  ;;  %v98_v32 = vld [vmem:[%s919_s1 + $0x200] sm:$0xff] }
  0x17   :  { %571 = vmatpush3.bf16.msra.mxu1 %v570_v63  ;;  %541 = vmatprep.subr.bf16.mxu0 %v540_v0  ;;  %v81_v31 = vld [vmem:[%s919_s1 + $0x178] sm:$0xff]  ;;  %v99_v33 = vld [vmem:[%s919_s1 + $0x208] sm:$0xff]  ;;  %v550_v34 = vpack.c.bf16 %v49_v28, %v48_v27  ;;  %v100_v37 = vld [vmem:[%s919_s1 + $0x210] sm:$0xff] }
  0x18   :  { %573 = vmatprep.subr.bf16.mxu1 %v572_v4  ;;  %v582_v35 = vpack.c.bf16 %v81_v31, %v80_v29  ;;  %v584_v36 = vpack.c.bf16 %v99_v33, %v98_v32  ;;  %v101_v38 = vld [vmem:[%s919_s1 + $0x218] sm:$0xff]  ;;  %v14_v39 = vld [vmem:[%s920_s0] sm:$0xff]  ;;  %v16_v40 = vld [vmem:[%s920_s0 + $0x10] sm:$0xff] }
  0x19   :  { %v20_v41 = vld [vmem:[%s920_s0 + $0x30] sm:$0xff]  ;;  %v588_v42 = vpack.c.bf16 %v101_v38, %v100_v37  ;;  %v22_v43 = vld [vmem:[%s920_s0 + $0x40] sm:$0xff]  ;;  %v103_v45 = vld [vmem:[%s919_s1 + $0x228] sm:$0xff] }
  0x1a   :  { %543 = vmatpush3.bf16.msra.mxu0 %v542_v10  ;;  %v102_v44 = vld [vmem:[%s919_s1 + $0x220] sm:$0xff]  ;;  %v19_v46 = vld [vmem:[%s920_s0 + $0x28] sm:$0xff]  ;;  %v21_v47 = vld [vmem:[%s920_s0 + $0x38] sm:$0xff] }
  0x1b   :  { %575 = vmatpush3.bf16.msra.mxu1 %v574_v13  ;;  %545 = vmatprep.subr.bf16.mxu0 %v544_v14  ;;  %v25_v48 = vld [vmem:[%s920_s0 + $0x58] sm:$0xff]  ;;  %v592_v49 = vpack.c.bf16 %v103_v45, %v102_v44  ;;  %v27_v50 = vld [vmem:[%s920_s0 + $0x68] sm:$0xff]  ;;  %v104_v51 = vld [vmem:[%s919_s1 + $0x230] sm:$0xff] }
  0x1c   :  { %577 = vmatprep.subr.bf16.mxu1 %v576_v18  ;;  %v105_v52 = vld [vmem:[%s919_s1 + $0x238] sm:$0xff]  ;;  %v24_v53 = vld [vmem:[%s920_s0 + $0x50] sm:$0xff]  ;;  %v26_v54 = vld [vmem:[%s920_s0 + $0x60] sm:$0xff] }
  0x1d   :  { %v30_v55 = vld [vmem:[%s920_s0 + $0x80] sm:$0xff]  ;;  %v596_v56 = vpack.c.bf16 %v105_v52, %v104_v51  ;;  %v32_v57 = vld [vmem:[%s920_s0 + $0x90] sm:$0xff]  ;;  %v29_v58 = vld [vmem:[%s920_s0 + $0x78] sm:$0xff] }
  0x1e   :  { %547 = vmatpush3.bf16.msra.mxu0 %v546_v24  ;;  %v31_v59 = vld [vmem:[%s920_s0 + $0x88] sm:$0xff]  ;;  %v18_v60 = vld [vmem:[%s920_s0 + $0x20] sm:$0xff]  ;;  %v28_v61 = vld [vmem:[%s920_s0 + $0x70] sm:$0xff] }
  0x1f   :  { %579 = vmatpush3.bf16.msra.mxu1 %v578_v25  ;;  %549 = vmatprep.subr.bf16.mxu0 %v548_v26  ;;  %v23_v62 = vld [vmem:[%s920_s0 + $0x48] sm:$0xff]  ;;  %v33_v63 = vld [vmem:[%s920_s0 + $0x98] sm:$0xff]  ;;  %v393_v1 = vld [vmem:[%s921_s2] ss:$0 sm:$0xff] }
  0x20   :  { %581 = vmatprep.subr.bf16.mxu1 %v580_v30 }
  0x22   :  { %551 = vmatpush3.bf16.msra.mxu0 %v550_v34 }
  0x23   :  { %583 = vmatpush3.bf16.msra.mxu1 %v582_v35  ;;  %585 = vmatprep.subr.bf16.mxu0 %v584_v36 }
  0x24   :  { %600 = vmatprep.subr.bf16.mxu1 %v584_v36 }
  0x25   :  { %191 = vmatmul.mubr.f32.vlgmr.msra.gmra.mrb[0].mxu0 %v14_v39 }
  0x26   :  { %276 = vmatmul.mubr.f32.vlgmr.msra.gmra.mrb[0].mxu1 %v16_v40  ;;  %587 = vmatpush3.bf16.msra.mxu0 %v584_v36 }
  0x27   :  { %604 = vmatpush3.bf16.msra.mxu1 %v584_v36  ;;  %195 = vmatprep.mubr.f32.mxu0 %v20_v41 }
  0x28   :  { %280 = vmatprep.mubr.f32.mxu1 %v22_v43  ;;  %589 = vmatprep.subr.bf16.mxu0 %v588_v42 }
  0x29   :  { %196 = vmatmul.mubr.f32.gmra.mrb[2].mxu0 %v19_v46  ;;  %601 = vmatprep.subr.bf16.mxu1 %v588_v42 }
  0x2a   :  { %281 = vmatmul.mubr.f32.gmra.mrb[2].mxu1 %v21_v47  ;;  %591 = vmatpush3.bf16.msra.mxu0 %v588_v42 }
  0x2b   :  { %605 = vmatpush3.bf16.msra.mxu1 %v588_v42  ;;  %200 = vmatprep.mubr.f32.mxu0 %v25_v48 }
  0x2c   :  { %285 = vmatprep.mubr.f32.mxu1 %v27_v50  ;;  %593 = vmatprep.subr.bf16.mxu0 %v592_v49 }
  0x2d   :  { %201 = vmatmul.mubr.f32.gmra.mrb[4].mxu0 %v24_v53  ;;  %602 = vmatprep.subr.bf16.mxu1 %v592_v49 }
  0x2e   :  { %286 = vmatmul.mubr.f32.gmra.mrb[4].mxu1 %v26_v54  ;;  %595 = vmatpush3.bf16.msra.mxu0 %v592_v49 }
  0x2f   :  { %606 = vmatpush3.bf16.msra.mxu1 %v592_v49  ;;  %205 = vmatprep.mubr.f32.mxu0 %v30_v55 }
  0x30   :  { %290 = vmatprep.mubr.f32.mxu1 %v32_v57  ;;  %597 = vmatprep.subr.bf16.mxu0 %v596_v56 }
  0x31   :  { %206 = vmatmul.mubr.f32.gmra.mrb[6].mxu0 %v29_v58  ;;  %603 = vmatprep.subr.bf16.mxu1 %v596_v56 }
  0x32   :  { %291 = vmatmul.mubr.f32.gmra.mrb[6].mxu1 %v31_v59  ;;  %599 = vmatpush3.bf16.msra.mxu0 %v596_v56 }
  0x33   :  { %607 = vmatpush3.bf16.msra.mxu1 %v596_v56  ;;  %514 = vmatprep.mubr.msk.f32.mxu0 %vm113_vm0, %v18_v60 }
  0x34   :  { %517 = vmatprep.mubr.msk.f32.mxu1 %vm113_vm0, %v28_v61 }
  0x35   :  { %515 = vmatmul.mubr.msk.f32.vlgmr.msra.gmra.mrb[8].mxu0 %vm113_vm0, %v23_v62 }
  0x36   :  { %518 = vmatmul.mubr.msk.f32.vlgmr.msra.gmra.mrb[8].mxu1 %vm113_vm0, %v33_v63 }
  0xf8   :  { %v430_v0 = vpop.f32.mrb[0].mxu0 }
  0xf9   :  { %v431_v2 = vpop.f32.mrb[1].mxu0  ;;  %v474_v3 = vpop.f32.mrb[0].mxu1 }
  0xfa   :  { %v432_v4 = vadd.f32 %v431_v2, %v430_v0  ;;  %v475_v5 = vpop.f32.mrb[1].mxu1 }
  0xfb   :  { %v476_v6 = vadd.f32 %v475_v5, %v474_v3 }
  0xfc   :  { %v193_v7 = vadd.f32 %v432_v4, %v393_v1  ;;  %v433_v8 = vpop.f32.mrb[2].mxu0 }
  0xfd   :  { %v434_v9 = vpop.f32.mrb[3].mxu0  ;;  %v477_v10 = vpop.f32.mrb[2].mxu1 }
  0xfe   :  { %v435_v11 = vadd.f32 %v434_v9, %v433_v8  ;;  %v478_v12 = vpop.f32.mrb[3].mxu1  ;;  %v278_v13 = vadd.f32 %v476_v6, %v193_v7 }
  0xff   :  { %v479_v14 = vadd.f32 %v478_v12, %v477_v10 }
 0x100   :  { %v198_v15 = vadd.f32 %v435_v11, %v393_v1  ;;  %v436_v16 = vpop.f32.mrb[4].mxu0 }
 0x101   :  { %v437_v17 = vpop.f32.mrb[5].mxu0  ;;  %v480_v18 = vpop.f32.mrb[4].mxu1 }
 0x102   :  { %v438_v19 = vadd.f32 %v437_v17, %v436_v16  ;;  %v481_v20 = vpop.f32.mrb[5].mxu1  ;;  %v283_v21 = vadd.f32 %v479_v14, %v198_v15 }
 0x103   :  { %v482_v22 = vadd.f32 %v481_v20, %v480_v18 }
 0x104   :  { %v203_v23 = vadd.f32 %v438_v19, %v393_v1  ;;  %v439_v24 = vpop.f32.mrb[6].mxu0 }
 0x105   :  { %v440_v25 = vpop.f32.mrb[7].mxu0  ;;  %v483_v26 = vpop.f32.mrb[6].mxu1 }
 0x106   :  { %v441_v27 = vadd.f32 %v440_v25, %v439_v24  ;;  %v484_v28 = vpop.f32.mrb[7].mxu1  ;;  %v288_v29 = vadd.f32 %v482_v22, %v203_v23 }
 0x107   :  { %v485_v30 = vadd.f32 %v484_v28, %v483_v26 }
 0x108   :  { %v208_v31 = vadd.f32 %v441_v27, %v393_v1  ;;  %v516_v32 = vpop.f32.mrb[8].mxu0 }
 0x109   :  { %v368_v33 = vadd.f32 %v516_v32, %v283_v21  ;;  %v519_v34 = vpop.f32.mrb[8].mxu1  ;;  %v362_v35 = vpop.f32.mrb[9].mxu0 }
 0x10a   :  { %v293_v36 = vadd.f32 %v485_v30, %v208_v31  ;;  %v363_v37 = vadd.f32 %v362_v35, %v278_v13  ;;  %v372_v38 = vpop.f32.mrb[9].mxu1 }
 0x10b   :  { %v382_v39 = vmax.f32 %v368_v33, 0.0  ;;  %v373_v40 = vadd.f32 %v372_v38, %v288_v29 }
 0x10c   :  { %v378_v41 = vadd.f32 %v519_v34, %v293_v36  ;;  %v381_v42 = vmax.f32 %v363_v37, 0.0 }
 0x10d   :  { %386 = vst [vmem:[%s922_s3 + $0x8] sm:$0xff] %v382_v39  ;;  %v383_v43 = vmax.f32 %v373_v40, 0.0 }
 0x10e   :  { %v384_v44 = vmax.f32 %v378_v41, 0.0  ;;  %385 = vst [vmem:[%s922_s3] sm:$0xff] %v381_v42 }
 0x10f   :  { %387 = vst [vmem:[%s922_s3 + $0x10] sm:$0xff] %v383_v43 }
 0x110   :  { %388 = vst [vmem:[%s922_s3 + $0x18] sm:$0xff] %v384_v44 }

// kernel: modified_lenet_forward.9
= control target key start
LH: loop header
LB: loop body
LE: loop exit
PB: predicated region body
PF: predicated region fallthrough
CT: control target
= control target key end

     0   :  { %v745_v47 = vmov 1983009808   ;;  %v104_v49 = vlaneseq  ;;  %s1078_s0 = inlined_call_operand.vmem [shape: f32[2,512], index: 0, kind: input, shape index: {}]   ;;  %s1079_s1 = inlined_call_operand.vmem [shape: f32[512,128], index: 1, kind: input, shape index: {}]   ;;  %s1080_s2 = inlined_call_operand.vmem [shape: f32[1,128], index: 2, kind: input, shape index: {}]   ;;  %s1081_s3 = inlined_call_operand.vmem [shape: f32[128,64], index: 3, kind: input, shape index: {}]   ;;  %s1082_s4 = inlined_call_operand.vmem [shape: f32[1,64], index: 4, kind: input, shape index: {}]   ;;  %s1083_s5 = inlined_call_operand.vmem [shape: f32[64,10], index: 5, kind: input, shape index: {}]   ;;  %s1084_s6 = inlined_call_operand.vmem [shape: f32[1,10], index: 6, kind: input, shape index: {}]   ;;  %s1085_s7 = inlined_call_operand.hbm [shape: f32[2,10], index: 7, kind: output, shape index: {}]  }
   0x1   :  { %v44_v0 = vld [vmem:[%s1079_s1 + $0x80] sm:$0xff]  ;;  %v45_v1 = vld [vmem:[%s1079_s1 + $0x88] sm:$0xff]  ;;  %v46_v11 = vld [vmem:[%s1079_s1 + $0x90] sm:$0xff]  ;;  %v102_v48 = vunpack.c.l.s4 %v745_v47 }
   0x2   :  { %v28_v2 = vld [vmem:[%s1079_s1] sm:$0xff]  ;;  %v615_v3 = vpack.c.bf16 %v45_v1, %v44_v0  ;;  %v29_v4 = vld [vmem:[%s1079_s1 + $0x8] sm:$0xff]  ;;  %v47_v13 = vld [vmem:[%s1079_s1 + $0x98] sm:$0xff]  ;;  %v105_v0 = vshrl.u32 %v104_v49, 7 }
   0x3   :  { %v76_v5 = vld [vmem:[%s1079_s1 + $0x180] sm:$0xff]  ;;  %v77_v6 = vld [vmem:[%s1079_s1 + $0x188] sm:$0xff]  ;;  %v617_v7 = vpack.c.bf16 %v29_v4, %v28_v2  ;;  %v30_v14 = vld [vmem:[%s1079_s1 + $0x10] sm:$0xff]  ;;  %v619_v16 = vpack.c.bf16 %v47_v13, %v46_v11  ;;  %v103_v63 = vunpack.c.0.s8 %v102_v48 }
   0x4   :  { %v647_v8 = vpack.c.bf16 %v77_v6, %v76_v5  ;;  %v60_v9 = vld [vmem:[%s1079_s1 + $0x100] sm:$0xff]  ;;  %v61_v10 = vld [vmem:[%s1079_s1 + $0x108] sm:$0xff]  ;;  %616 = vmatprep.subr.bf16.mxu0 %v615_v3  ;;  %v31_v15 = vld [vmem:[%s1079_s1 + $0x18] sm:$0xff] }
   0x5   :  { %v649_v12 = vpack.c.bf16 %v61_v10, %v60_v9  ;;  %618 = vmatpush3.bf16.msra.mxu0 %v617_v7  ;;  %v621_v17 = vpack.c.bf16 %v31_v15, %v30_v14  ;;  %v78_v18 = vld [vmem:[%s1079_s1 + $0x190] sm:$0xff]  ;;  %v79_v19 = vld [vmem:[%s1079_s1 + $0x198] sm:$0xff]  ;;  %v48_v23 = vld [vmem:[%s1079_s1 + $0xa0] sm:$0xff]  ;;  %v106_v13 = vsub.s32 %v103_v63, %v105_v0 }
   0x6   :  { %648 = vmatprep.subr.bf16.mxu1 %v647_v8  ;;  %v62_v20 = vld [vmem:[%s1079_s1 + $0x110] sm:$0xff]  ;;  %v651_v21 = vpack.c.bf16 %v79_v19, %v78_v18  ;;  %v63_v22 = vld [vmem:[%s1079_s1 + $0x118] sm:$0xff]  ;;  %v49_v24 = vld [vmem:[%s1079_s1 + $0xa8] sm:$0xff]  ;;  %620 = vmatprep.subr.bf16.mxu0 %v619_v16 }
   0x7   :  { %650 = vmatpush3.bf16.msra.mxu1 %v649_v12  ;;  %v653_v25 = vpack.c.bf16 %v63_v22, %v62_v20  ;;  %v623_v26 = vpack.c.bf16 %v49_v24, %v48_v23  ;;  %v32_v27 = vld [vmem:[%s1079_s1 + $0x20] sm:$0xff]  ;;  %v33_v28 = vld [vmem:[%s1079_s1 + $0x28] sm:$0xff]  ;;  %v50_v35 = vld [vmem:[%s1079_s1 + $0xb0] sm:$0xff] }
   0x8   :  { %v80_v29 = vld [vmem:[%s1079_s1 + $0x1a0] sm:$0xff]  ;;  %652 = vmatprep.subr.bf16.mxu1 %v651_v21  ;;  %v81_v30 = vld [vmem:[%s1079_s1 + $0x1a8] sm:$0xff]  ;;  %v625_v33 = vpack.c.bf16 %v33_v28, %v32_v27  ;;  %v51_v36 = vld [vmem:[%s1079_s1 + $0xb8] sm:$0xff] }
   0x9   :  { %v64_v31 = vld [vmem:[%s1079_s1 + $0x120] sm:$0xff]  ;;  %v65_v32 = vld [vmem:[%s1079_s1 + $0x128] sm:$0xff]  ;;  %622 = vmatpush3.bf16.msra.mxu0 %v621_v17  ;;  %v655_v34 = vpack.c.bf16 %v81_v30, %v80_v29  ;;  %v34_v37 = vld [vmem:[%s1079_s1 + $0x30] sm:$0xff]  ;;  %v627_v39 = vpack.c.bf16 %v51_v36, %v50_v35 }
   0xa   :  { %624 = vmatprep.subr.bf16.mxu0 %v623_v26  ;;  %v657_v38 = vpack.c.bf16 %v65_v32, %v64_v31  ;;  %v35_v40 = vld [vmem:[%s1079_s1 + $0x38] sm:$0xff]  ;;  %v82_v41 = vld [vmem:[%s1079_s1 + $0x1b0] sm:$0xff]  ;;  %v52_v46 = vld [vmem:[%s1079_s1 + $0xc0] sm:$0xff] }
   0xb   :  { %654 = vmatpush3.bf16.msra.mxu1 %v653_v25  ;;  %v83_v42 = vld [vmem:[%s1079_s1 + $0x1b8] sm:$0xff]  ;;  %v66_v44 = vld [vmem:[%s1079_s1 + $0x130] sm:$0xff]  ;;  %v53_v50 = vld [vmem:[%s1079_s1 + $0xc8] sm:$0xff]  ;;  %v629_v51 = vpack.c.bf16 %v35_v40, %v34_v37 }
   0xc   :  { %656 = vmatprep.subr.bf16.mxu1 %v655_v34  ;;  %v659_v43 = vpack.c.bf16 %v83_v42, %v82_v41  ;;  %v67_v45 = vld [vmem:[%s1079_s1 + $0x138] sm:$0xff]  ;;  %v84_v52 = vld [vmem:[%s1079_s1 + $0x1c0] sm:$0xff]  ;;  %v85_v53 = vld [vmem:[%s1079_s1 + $0x1c8] sm:$0xff]  ;;  %v631_v55 = vpack.c.bf16 %v53_v50, %v52_v46 }
   0xd   :  { %626 = vmatpush3.bf16.msra.mxu0 %v625_v33  ;;  %v661_v54 = vpack.c.bf16 %v67_v45, %v66_v44  ;;  %v36_v56 = vld [vmem:[%s1079_s1 + $0x40] sm:$0xff]  ;;  %v37_v57 = vld [vmem:[%s1079_s1 + $0x48] sm:$0xff]  ;;  %v663_v59 = vpack.c.bf16 %v85_v53, %v84_v52  ;;  %v54_v61 = vld [vmem:[%s1079_s1 + $0xd0] sm:$0xff] }
   0xe   :  { %628 = vmatprep.subr.bf16.mxu0 %v627_v39  ;;  %v68_v58 = vld [vmem:[%s1079_s1 + $0x140] sm:$0xff]  ;;  %v69_v60 = vld [vmem:[%s1079_s1 + $0x148] sm:$0xff]  ;;  %v55_v62 = vld [vmem:[%s1079_s1 + $0xd8] sm:$0xff]  ;;  %v633_v3 = vpack.c.bf16 %v37_v57, %v36_v56 }
   0xf   :  { %658 = vmatpush3.bf16.msra.mxu1 %v657_v38  ;;  %v86_v1 = vld [vmem:[%s1079_s1 + $0x1d0] sm:$0xff]  ;;  %v87_v2 = vld [vmem:[%s1079_s1 + $0x1d8] sm:$0xff]  ;;  %v665_v4 = vpack.c.bf16 %v69_v60, %v68_v58  ;;  %v635_v5 = vpack.c.bf16 %v55_v62, %v54_v61  ;;  %v56_v11 = vld [vmem:[%s1079_s1 + $0xe0] sm:$0xff] }
  0x10   :  { %660 = vmatprep.subr.bf16.mxu1 %v659_v43  ;;  %v38_v6 = vld [vmem:[%s1079_s1 + $0x50] sm:$0xff]  ;;  %v39_v7 = vld [vmem:[%s1079_s1 + $0x58] sm:$0xff]  ;;  %v667_v9 = vpack.c.bf16 %v87_v2, %v86_v1  ;;  %v57_v12 = vld [vmem:[%s1079_s1 + $0xe8] sm:$0xff] }
  0x11   :  { %630 = vmatpush3.bf16.msra.mxu0 %v629_v51  ;;  %v70_v8 = vld [vmem:[%s1079_s1 + $0x150] sm:$0xff]  ;;  %v71_v10 = vld [vmem:[%s1079_s1 + $0x158] sm:$0xff]  ;;  %v88_v14 = vld [vmem:[%s1079_s1 + $0x1e0] sm:$0xff]  ;;  %v637_v16 = vpack.c.bf16 %v39_v7, %v38_v6  ;;  %v639_v19 = vpack.c.bf16 %v57_v12, %v56_v11 }
  0x12   :  { %632 = vmatprep.subr.bf16.mxu0 %v631_v55  ;;  %v89_v15 = vld [vmem:[%s1079_s1 + $0x1e8] sm:$0xff]  ;;  %v40_v17 = vld [vmem:[%s1079_s1 + $0x60] sm:$0xff]  ;;  %v669_v18 = vpack.c.bf16 %v71_v10, %v70_v8  ;;  %v58_v25 = vld [vmem:[%s1079_s1 + $0xf0] sm:$0xff] }
  0x13   :  { %662 = vmatpush3.bf16.msra.mxu1 %v661_v54  ;;  %v41_v20 = vld [vmem:[%s1079_s1 + $0x68] sm:$0xff]  ;;  %v72_v21 = vld [vmem:[%s1079_s1 + $0x160] sm:$0xff]  ;;  %v671_v23 = vpack.c.bf16 %v89_v15, %v88_v14  ;;  %v59_v26 = vld [vmem:[%s1079_s1 + $0xf8] sm:$0xff] }
  0x14   :  { %664 = vmatprep.subr.bf16.mxu1 %v663_v59  ;;  %v27_v22 = vld [vmem:[%s1078_s0] sm:$0xff]  ;;  %v73_v24 = vld [vmem:[%s1079_s1 + $0x168] sm:$0xff]  ;;  %v90_v29 = vld [vmem:[%s1079_s1 + $0x1f0] sm:$0xff]  ;;  %v641_v31 = vpack.c.bf16 %v41_v20, %v40_v17  ;;  %v643_v35 = vpack.c.bf16 %v59_v26, %v58_v25 }
  0x15   :  { %634 = vmatpush3.bf16.msra.mxu0 %v633_v3  ;;  %v107_v27 = vrot.slane %v27_v22, %v106_v13  ;;  %v100_v28 = vcombine.high %v27_v22, %v27_v22  ;;  %v91_v30 = vld [vmem:[%s1079_s1 + $0x1f8] sm:$0xff]  ;;  %v673_v34 = vpack.c.bf16 %v73_v24, %v72_v21  ;;  %v42_v36 = vld [vmem:[%s1079_s1 + $0x70] sm:$0xff] }
  0x16   :  { %636 = vmatprep.subr.bf16.mxu0 %v635_v5  ;;  %v43_v37 = vld [vmem:[%s1079_s1 + $0x78] sm:$0xff] }
  0x17   :  { %666 = vmatpush3.bf16.msra.mxu1 %v665_v4  ;;  %v115_v32 = vcombine.high %v107_v27, %v107_v27  ;;  %v114_v33 = vrot.slane %v100_v28, %v106_v13 }
  0x18   :  { %668 = vmatprep.subr.bf16.mxu1 %v667_v9 }
  0x19   :  { %638 = vmatpush3.bf16.msra.mxu0 %v637_v16 }
  0x1a   :  { %640 = vmatprep.subr.bf16.mxu0 %v639_v19 }
  0x1b   :  { %670 = vmatpush3.bf16.msra.mxu1 %v669_v18 }
  0x1c   :  { %12 = vsyncpa [#allocation3], 0  ;;  %672 = vmatprep.subr.bf16.mxu1 %v671_v23  ;;  %v675_v38 = vpack.c.bf16 %v91_v30, %v90_v29  ;;  %v74_v39 = vld [vmem:[%s1079_s1 + $0x170] sm:$0xff]  ;;  %v75_v40 = vld [vmem:[%s1079_s1 + $0x178] sm:$0xff]  ;;  %185 = vmatprep.mubr.f32.mxu0 %v115_v32  ;;  %v116_v41 = vcombine.high %v114_v33, %v114_v33  ;;  %v645_v42 = vpack.c.bf16 %v43_v37, %v42_v36  ;;  %v746_v47 = vmov 0.0|0.0   ;;  %s749_s17 = smov [#allocation2]  }
  0x1d   :  { %642 = vmatpush3.bf16.msra.mxu0 %v641_v31  ;;  %v677_v43 = vpack.c.bf16 %v75_v40, %v74_v39  ;;  %v262_v44 = vld [vmem:[%s1081_s3] sm:$0xff]  ;;  %v263_v45 = vld [vmem:[%s1081_s3 + $0x8] sm:$0xff]  ;;  %v264_v48 = vld [vmem:[%s1081_s3 + $0x10] sm:$0xff]  ;;  %vm747_vm0 = vmmov 0   ;;  %v748_v5 = vmov 0.0   ;;  %vm371_vm1 = vcmask 523264  }
  0x1e   :  { %255 = vmatprep.mubr.f32.mxu1 %v116_v41  ;;  %644 = vmatprep.subr.bf16.mxu0 %v643_v35  ;;  %v680_v46 = vpack.c.bf16 %v263_v45, %v262_v44  ;;  %v265_v49 = vld [vmem:[%s1081_s3 + $0x18] sm:$0xff]  ;;  %v266_v51 = vld [vmem:[%s1081_s3 + $0x20] sm:$0xff]  ;;  %v267_v52 = vld [vmem:[%s1081_s3 + $0x28] sm:$0xff]  ;;  %s453_s18 = sshll.u32 %s749_s17, 4  ;;  %vm445_vm2 = vcmask 74752   ;;  %s454_s18 = int_to_ptr.vmem [resolvable:$true] %s453_s18 }
  0x1f   :  { %674 = vmatpush3.bf16.msra.mxu1 %v673_v34  ;;  %v683_v50 = vpack.c.bf16 %v265_v49, %v264_v48  ;;  %v686_v53 = vpack.c.bf16 %v267_v52, %v266_v51  ;;  %v268_v54 = vld [vmem:[%s1081_s3 + $0x30] sm:$0xff]  ;;  %v269_v55 = vld [vmem:[%s1081_s3 + $0x38] sm:$0xff]  ;;  %v270_v57 = vld [vmem:[%s1081_s3 + $0x40] sm:$0xff]  ;;  %p726_p1 = scmp.lt.s32.totalorder %s454_s18, %s454_s18 }
  0x20   :  { %676 = vmatprep.subr.bf16.mxu1 %v675_v38  ;;  %v689_v56 = vpack.c.bf16 %v269_v55, %v268_v54  ;;  %v271_v58 = vld [vmem:[%s1081_s3 + $0x48] sm:$0xff]  ;;  %v272_v60 = vld [vmem:[%s1081_s3 + $0x50] sm:$0xff]  ;;  %v273_v61 = vld [vmem:[%s1081_s3 + $0x58] sm:$0xff] }
  0x21   :  { %646 = vmatpush3.bf16.msra.mxu0 %v645_v42  ;;  %v692_v59 = vpack.c.bf16 %v271_v58, %v270_v57  ;;  %v695_v62 = vpack.c.bf16 %v273_v61, %v272_v60  ;;  %v274_v63 = vld [vmem:[%s1081_s3 + $0x60] sm:$0xff]  ;;  %v275_v0 = vld [vmem:[%s1081_s3 + $0x68] sm:$0xff]  ;;  %v276_v2 = vld [vmem:[%s1081_s3 + $0x70] sm:$0xff] }
  0x22   :  { %679 = vmatprep.subr.bf16.mxu0 %v746_v47  ;;  %v698_v1 = vpack.c.bf16 %v275_v0, %v274_v63  ;;  %v277_v3 = vld [vmem:[%s1081_s3 + $0x78] sm:$0xff]  ;;  %v356_v6 = vld [vmem:[%s1083_s5] sm:$0xff]  ;;  %v357_v7 = vld [vmem:[%s1083_s5 + $0x8] sm:$0xff] }
  0x23   :  { %678 = vmatpush3.bf16.msra.mxu1 %v677_v43  ;;  %v701_v4 = vpack.c.bf16 %v277_v3, %v276_v2  ;;  %v358_v8 = vld [vmem:[%s1083_s5 + $0x10] sm:$0xff]  ;;  %v704_v9 = vpack.c.bf16 %v357_v7, %v356_v6  ;;  %v359_v10 = vld [vmem:[%s1083_s5 + $0x18] sm:$0xff]  ;;  %v360_v12 = vld [vmem:[%s1083_s5 + $0x20] sm:$0xff] }
  0x24   :  { %703 = vmatprep.subr.bf16.mxu1 %v746_v47  ;;  %186 = vmatmul.mubr.f32.vlgmr.msra.gmra.mrb[0].mxu0 %v107_v27  ;;  %v707_v11 = vpack.c.bf16 %v359_v10, %v358_v8  ;;  %v361_v13 = vld [vmem:[%s1083_s5 + $0x28] sm:$0xff]  ;;  %v461_v16 = vld [vmem:[%s1080_s2] ss:$0 sm:$0xff]  ;;  %v362_v25 = vld [vmem:[%s1083_s5 + $0x30] sm:$0xff] }
  0x25   :  { %681 = vmatpush3.bf16.msra.mxu0 %v680_v46  ;;  %593 = vmatprep.mubr.msk.f32.mxu0 %vm747_vm0, %v748_v5  ;;  %v710_v14 = vpack.c.bf16 %v361_v13, %v360_v12  ;;  %v363_v26 = vld [vmem:[%s1083_s5 + $0x38] sm:$0xff]  ;;  %v462_v28 = vld [vmem:[%s1082_s4] ss:$0 sm:$0xff]  ;;  %s721_s5 = scalar_lea.vmem %s454_s18, 32 }
  0x26   :  { %256 = vmatmul.mubr.f32.vlgmr.msra.gmra.mrb[0].mxu1 %v114_v33  ;;  %682 = vmatprep.subr.bf16.mxu0 %v746_v47  ;;  %v713_v27 = vpack.c.bf16 %v363_v26, %v362_v25  ;;  %v463_v33 = vld [vmem:[%s1084_s6] ss:$0 sm:$0xff]  ;;  %p722_p0 = scmp.ne.s32.totalorder %s454_s18, %s721_s5  ;;  %p727_p2 = scmp.lt.s32.totalorder %s721_s5, %s721_s5 }
  0x27   :  { %612 = vmatprep.mubr.msk.f32.mxu1 %vm747_vm0, %v748_v5  ;;  %705 = vmatpush3.bf16.msra.mxu1 %v704_v9 }
  0x28   :  { %706 = vmatprep.subr.bf16.mxu1 %v746_v47  ;;  %p728_p3 = por %p727_p2, %p726_p1 }
  0x29   :  { %684 = vmatpush3.bf16.msra.mxu0 %v683_v50 }
  0x2a   :  { %685 = vmatprep.subr.bf16.mxu0 %v746_v47  ;;  %p729_p4 = pnand %p728_p3, %p722_p0 }
  0x2b   :  { %708 = vmatpush3.bf16.msra.mxu1 %v707_v11 }
  0x2c   :  { %709 = vmatprep.subr.bf16.mxu1 %v746_v47 }
  0x2d   :  { %687 = vmatpush3.bf16.msra.mxu0 %v686_v53 }
  0x2e   :  { %688 = vmatprep.subr.bf16.mxu0 %v746_v47 }
  0x2f   :  { %711 = vmatpush3.bf16.msra.mxu1 %v710_v14 }
  0x30   :  { %712 = vmatprep.subr.bf16.mxu1 %v746_v47 }
  0x31   :  { %690 = vmatpush3.bf16.msra.mxu0 %v689_v56 }
  0x32   :  { %691 = vmatprep.subr.bf16.mxu0 %v746_v47 }
  0x33   :  { %714 = vmatpush3.bf16.msra.mxu1 %v713_v27 }
  0x35   :  { %693 = vmatpush3.bf16.msra.mxu0 %v692_v59 }
  0x36   :  { %694 = vmatprep.subr.bf16.mxu0 %v746_v47 }
  0x39   :  { %696 = vmatpush3.bf16.msra.mxu0 %v695_v62 }
  0x3a   :  { %697 = vmatprep.subr.bf16.mxu0 %v746_v47 }
  0x3d   :  { %699 = vmatpush3.bf16.msra.mxu0 %v698_v1 }
  0x3e   :  { %700 = vmatprep.subr.bf16.mxu0 %v746_v47 }
  0x41   :  { %702 = vmatpush3.bf16.msra.mxu0 %v701_v4 }
  0xf7   :  { %v497_v15 = vpop.f32.mrb[0].mxu0 }
  0xf8   :  { %v498_v17 = vpop.f32.mrb[1].mxu0 }
  0xf9   :  { %v532_v18 = vpop.f32.mrb[0].mxu1  ;;  %v499_v19 = vadd.f32 %v498_v17, %v497_v15 }
  0xfa   :  { %v533_v20 = vpop.f32.mrb[1].mxu1 }
  0xfb   :  { %v534_v21 = vadd.f32 %v533_v20, %v532_v18  ;;  %v188_v22 = vadd.f32 %v499_v19, %v461_v16 }
  0xfd   :  { %v258_v23 = vadd.f32 %v534_v21, %v188_v22 }
  0xff   :  { %v261_v24 = vmax.f32 %v258_v23, 0.0 }
 0x101   :  { %594 = vmatmul.mubr.f32.vlgmr.msra.gmra.mrb[2].mxu0 %v261_v24 }
 0x1d4   :  { %v351_v29 = vpop.f32.mrb[2].mxu0 }
 0x1d5   :  { %v352_v30 = vadd.f32 %v462_v28, %v351_v29  ;;  %v595_v31 = vpop.f32.mrb[3].mxu0 }
 0x1d7   :  { %v355_v32 = vmax.f32 %v352_v30, 0.0 }
 0x1d9   :  { %613 = vmatmul.mubr.msk.f32.vlgmr.msra.gmra.mrb[2].mxu1 %vm371_vm1, %v355_v32 }
 0x2ac   :  { %v441_v34 = vpop.f32.mrb[2].mxu1 }
 0x2ad   :  { %v442_v35 = vadd.f32 %v463_v33, %v441_v34  ;;  %v614_v36 = vpop.f32.mrb[3].mxu1 }
 0x2af   :  { %446 = vst.msk [vmem:[#allocation2] sm:$0x3] %vm445_vm2, %v442_v35 }
 0x2b0   :  { %732 = shalt.err (!%p729_p4)
}
 0x2b1   :  { %s733_s19 = scalar_lea.hbm %s1085_s7, 32 }
 0x2b2   :  { %p734_p5 = scmp.ne.s32.totalorder %s1085_s7, %s733_s19  ;;  %p737_p6 = scmp.lt.u32.totalorder %s733_s19, %s1085_s7 }
 0x2b4   :  { %p739_p7 = pnand %p737_p6, %p734_p5 }
 0x2b6   :  { %742 = shalt.err (!%p739_p7)
}
 0x2b7   :  { %456 = dma.vmem_to_hbm [thread:$0]  %s454_s18, 32, %s1085_s7, [#allocation3]  }
 0x2b8   :  { %743 = dma.done.wait [#allocation3], 32  }
 0x2b9   :  { %744 = vsyncadd [#allocation3], 4294967264 }
 0x2ba   :  { %460 = vsyncpa [#allocation3], 1 }

</bundles_post_ra>
